<compile_context>
chip_gen: v6e
topology: v6e:2x2x1
jax: 0.10.0
libtpu: 0.0.40
codegen_flags: <defaults>
</compile_context>

<pallas_src>
import numpy as np
import jax
import jax.numpy as jnp
from jax.experimental import pallas as pl
from jax.experimental.pallas import tpu as pltpu

# ----------------------------- config ---------------------------------------
BERT_HID = 24
ENTITY_TYPE_SIZE = 4
ENTITY_ID_SIZE = 4
GCN_DIM = BERT_HID + ENTITY_TYPE_SIZE + ENTITY_ID_SIZE        # 32
GCN_LAYERS = 2
BANK_SIZE = GCN_DIM * (GCN_LAYERS + 1)                        # 96
RELATION_NUM = 8
NUM_RELS = 3                                                  # intra/inter/global
VOCAB = 50
ENTITY_TYPE_NUM = 6
ENTITY_TYPE_PAD = 0
MAX_ENTITY_NUM = 10
ENTITY_ID_PAD = 0

BSZ = 2
SLEN = 16
MENTION_NUM = 4          # mentions per doc
ENT_NUM = 3              # entities per doc
NODES_PER_DOC = MENTION_NUM + 1
H_T_LIMIT = 4

F32 = jnp.float32
BF16 = jnp.bfloat16

# -------- batched ("stacked along M") sizes ----------------------------------
N_TOTAL = BSZ * NODES_PER_DOC           # 10  mention-graph nodes, all docs
ENC_FLAT = BSZ * SLEN                   # 32  flattened encoder rows
ENC_ROWS = ENC_FLAT + BSZ               # 34  + one zero-padded cls row per doc
ENT_T = BSZ * ENT_NUM                   # 6   entities, all docs
PAIR_T = BSZ * H_T_LIMIT                # 8   (h,t) pairs, all docs
EE_T = BSZ * ENT_NUM * ENT_NUM          # 18  dense entity-graph edges, all docs

PRED_IN = BANK_SIZE * 5 + GCN_DIM * 4   # 608
PRED_HID = BANK_SIZE * 2                # 192


def _pad8(x):
    return ((x + 7) // 8) * 8


# -------- host data slab layout (rows; every section 8-row aligned) ----------
OFF_SEL = 0                                   # [N_TOTAL, ENC_ROWS] mention pool + cls
OFF_A1 = OFF_SEL + _pad8(N_TOTAL)             # [N_TOTAL, N_TOTAL] intra  (right-norm, blkdiag)
OFF_A2 = OFF_A1 + _pad8(N_TOTAL)              # inter
OFF_A3 = OFF_A2 + _pad8(N_TOTAL)              # global
OFF_E2M = OFF_A3 + _pad8(N_TOTAL)             # [ENT_T, N_TOTAL] entity pooling
OFF_GH = OFF_E2M + _pad8(ENT_T)               # [PAIR_T, ENT_T]  head gather
OFF_GT = OFF_GH + _pad8(PAIR_T)               # [PAIR_T, ENT_T]  tail gather
OFF_GSEL = OFF_GT + _pad8(PAIR_T)             # [PAIR_T, N_TOTAL] per-pair global-node select
OFF_PS0 = OFF_GSEL + _pad8(PAIR_T)            # [PAIR_T, EE_T] path: forward_first
OFF_PS1 = OFF_PS0 + _pad8(PAIR_T)             #                 forward_second
OFF_PS2 = OFF_PS1 + _pad8(PAIR_T)             #                 backward_first
OFF_PS3 = OFF_PS2 + _pad8(PAIR_T)             #                 backward_second
OFF_SSRC = OFF_PS3 + _pad8(PAIR_T)            # [EE_T, ENT_T] edge src one-hot
OFF_SDST = OFF_SSRC + _pad8(EE_T)             # [EE_T, ENT_T] edge dst one-hot
SLAB_ROWS = OFF_SDST + _pad8(EE_T)            # 176
SLAB_COLS = ENC_ROWS                          # 34

# -------- weight slab layout (bf16, rows x 192 cols) --------------------------
OFF_W_GCN = 0                                           # 2 x [4*D, D] row-stacked
OFF_W_EDGE = OFF_W_GCN + GCN_LAYERS * 4 * GCN_DIM       # [2*D, D]
OFF_W_PATH = OFF_W_EDGE + 2 * GCN_DIM                   # [4*D, 4*D]
OFF_W_P1 = OFF_W_PATH + 4 * GCN_DIM                     # [608, 192]
OFF_W_P2 = OFF_W_P1 + PRED_IN                           # [192, 8]
W_ROWS = OFF_W_P2 + PRED_HID                            # 1248
W_COLS = PRED_HID                                       # 192
B_ROWS = 8                                              # bias slab rows (f32)


# ----------------------------- fused Pallas kernel ---------------------------
def _bdot(a, b):
    """MXU matmul for weight applications: bf16 operands, f32 accumulate."""
    return jnp.dot(a.astype(BF16), b.astype(BF16),
                   preferred_element_type=jnp.float32)


def _fdot(a, b):
    """Small f32 selection/adjacency matmuls (exact 1/k coefficients)."""
    return jnp.dot(a, b, preferred_element_type=jnp.float32)


def _fused_kernel(enc_ref, slab_ref, w_ref, b_ref, out_ref):
    d = GCN_DIM

    enc = enc_ref[...]                                            # [34, 32] f32

    # ---- mention pooling + cls rows (all docs stacked) -----------------------
    sel = slab_ref[OFF_SEL:OFF_SEL + N_TOTAL, 0:ENC_ROWS]         # [10, 34]
    h = _fdot(sel, enc)                                           # [10, 32]

    a1 = slab_ref[OFF_A1:OFF_A1 + N_TOTAL, 0:N_TOTAL]
    a2 = slab_ref[OFF_A2:OFF_A2 + N_TOTAL, 0:N_TOTAL]
    a3 = slab_ref[OFF_A3:OFF_A3 + N_TOTAL, 0:N_TOTAL]

    # ---- relational GCN layers (lane-dense: one 128-K MXU push per layer) ----
    # out = tanh([H | A1@H | A2@H | A3@H] @ [W_loop; W_intra; W_inter; W_glob] + b)
    banks = [h]
    for l in range(GCN_LAYERS):
        hcat = jnp.concatenate(
            [h, _fdot(a1, h), _fdot(a2, h), _fdot(a3, h)], axis=-1)   # [10, 128]
        w_l = w_ref[OFF_W_GCN + l * 4 * d:OFF_W_GCN + (l + 1) * 4 * d, 0:d]
        h = jnp.tanh(_bdot(hcat, w_l) + b_ref[l:l + 1, 0:d])
        banks.append(h)
    bank = jnp.concatenate(banks, axis=-1)                        # [10, 96]

    # ---- entity pooling -------------------------------------------------------
    e2m = slab_ref[OFF_E2M:OFF_E2M + ENT_T, 0:N_TOTAL]
    entity_bank = _fdot(e2m, bank)                                # [6, 96]
    ent_feat = entity_bank[:, BANK_SIZE - d:]                     # [6, 32] last-layer feats

    # ---- edge layer on the dense entity graphs (all docs' edges stacked) -----
    ssrc = slab_ref[OFF_SSRC:OFF_SSRC + EE_T, 0:ENT_T]
    sdst = slab_ref[OFF_SDST:OFF_SDST + EE_T, 0:ENT_T]
    edge_in = jnp.concatenate([_fdot(ssrc, ent_feat),
                               _fdot(sdst, ent_feat)], axis=-1)   # [18, 64]
    w_e = w_ref[OFF_W_EDGE:OFF_W_EDGE + 2 * d, 0:d]
    edge = jnp.tanh(_bdot(edge_in, w_e) + b_ref[2:3, 0:d])        # [18, 32]

    # ---- path info ------------------------------------------------------------
    # Bilinear attention is degenerate (softmax over a length-1 axis == 1), so
    # its value is the unweighted sum over middle nodes, expressed as host
    # precomputed count matrices over the stacked dense edges.
    ps0 = slab_ref[OFF_PS0:OFF_PS0 + PAIR_T, 0:EE_T]
    ps1 = slab_ref[OFF_PS1:OFF_PS1 + PAIR_T, 0:EE_T]
    ps2 = slab_ref[OFF_PS2:OFF_PS2 + PAIR_T, 0:EE_T]
    ps3 = slab_ref[OFF_PS3:OFF_PS3 + PAIR_T, 0:EE_T]
    path_raw = jnp.concatenate(
        [_fdot(ps0, edge), _fdot(ps1, edge),
         _fdot(ps2, edge), _fdot(ps3, edge)], axis=-1)            # [8, 128]
    w_p = w_ref[OFF_W_PATH:OFF_W_PATH + 4 * d, 0:4 * d]
    path_info = jnp.tanh(_bdot(path_raw, w_p) + b_ref[3:4, 0:4 * d])

    # ---- head / tail / per-pair global gathers --------------------------------
    gh = slab_ref[OFF_GH:OFF_GH + PAIR_T, 0:ENT_T]
    gt = slab_ref[OFF_GT:OFF_GT + PAIR_T, 0:ENT_T]
    gs = slab_ref[OFF_GSEL:OFF_GSEL + PAIR_T, 0:N_TOTAL]
    h_ent = _fdot(gh, entity_bank)                                # [8, 96]
    t_ent = _fdot(gt, entity_bank)                                # [8, 96]
    g_info = _fdot(gs, bank)                                      # [8, 96]

    # ---- prediction MLP: one lane-contiguous [P, 608] slab, single K=608 push -
    feat = jnp.concatenate(
        [h_ent, t_ent, jnp.abs(h_ent - t_ent), h_ent * t_ent, g_info, path_info],
        axis=-1)                                                  # [8, 608]
    w1 = w_ref[OFF_W_P1:OFF_W_P1 + PRED_IN, 0:PRED_HID]
    hid = jnp.tanh(_bdot(feat, w1) + b_ref[4:5, 0:PRED_HID])      # [8, 192]
    w2 = w_ref[OFF_W_P2:OFF_W_P2 + PRED_HID, 0:RELATION_NUM]
    out_ref[...] = _bdot(hid, w2) + b_ref[5:6, 0:RELATION_NUM]    # [8, 8]


def _build_fused_call():
    def full(shape):
        nz = (0,) * len(shape)
        return pl.BlockSpec(shape, lambda i, _nz=nz: _nz)

    return pl.pallas_call(
        _fused_kernel,
        out_shape=jax.ShapeDtypeStruct((PAIR_T, RELATION_NUM), F32),
        grid=(1,),                                   # single grid step: no per-step overhead
        in_specs=[full((ENC_ROWS, GCN_DIM)),         # encoder rows + cls rows
                  full((SLAB_ROWS, SLAB_COLS)),      # packed host selection/adjacency slab
                  full((W_ROWS, W_COLS)),            # packed bf16 weight slab
                  full((B_ROWS, W_COLS))],           # packed f32 bias slab
        out_specs=full((PAIR_T, RELATION_NUM)),
        compiler_params=pltpu.CompilerParams(
            dimension_semantics=("arbitrary",)),     # do not split tiny work across TCs
    )


_FUSED_CALL = _build_fused_call()


# ----------------------------- parameters ------------------------------------
def init_params(key):
    ks = jax.random.split(key, 9)
    s = 0.05
    p = {}
    # TODO(synk): BertModel stand-in (deterministic word embedding).
    p['word_emb'] = jax.random.normal(ks[0], (VOCAB, BERT_HID), F32) * s
    te = jax.random.normal(ks[1], (ENTITY_TYPE_NUM, ENTITY_TYPE_SIZE), F32) * s
    p['entity_type_emb'] = te.at[ENTITY_TYPE_PAD].set(0.0)
    ie = jax.random.normal(ks[2], (MAX_ENTITY_NUM + 1, ENTITY_ID_SIZE), F32) * s
    p['entity_id_emb'] = ie.at[ENTITY_ID_PAD].set(0.0)

    d = GCN_DIM
    w_loop = jax.random.normal(ks[3], (GCN_LAYERS, d, d), F32) * s
    w_rel = jax.random.normal(ks[4], (GCN_LAYERS, NUM_RELS, d, d), F32) * s
    edge_w = jax.random.normal(ks[5], (2 * d, d), F32) * s
    path_w = jax.random.normal(ks[6], (4 * d, 4 * d), F32) * s
    pred_w1 = jax.random.normal(ks[7], (PRED_IN, PRED_HID), F32) * s
    pred_w2 = jax.random.normal(ks[8], (PRED_HID, RELATION_NUM), F32) * s

    # one packed bf16 weight slab (single DMA)
    wslab = jnp.zeros((W_ROWS, W_COLS), F32)
    for l in range(GCN_LAYERS):
        w_stack = jnp.concatenate(
            [w_loop[l]] + [w_rel[l, r] for r in range(NUM_RELS)], axis=0)   # [4D, D]
        wslab = wslab.at[OFF_W_GCN + l * 4 * d:OFF_W_GCN + (l + 1) * 4 * d, 0:d].set(w_stack)
    wslab = wslab.at[OFF_W_EDGE:OFF_W_EDGE + 2 * d, 0:d].set(edge_w)
    wslab = wslab.at[OFF_W_PATH:OFF_W_PATH + 4 * d, 0:4 * d].set(path_w)
    wslab = wslab.at[OFF_W_P1:OFF_W_P1 + PRED_IN, 0:PRED_HID].set(pred_w1)
    wslab = wslab.at[OFF_W_P2:OFF_W_P2 + PRED_HID, 0:RELATION_NUM].set(pred_w2)
    p['w_slab'] = wslab.astype(BF16)

    # one packed f32 bias slab (all zero: GCN bias uses zeros_ init; Linear
    # biases are zero in this stand-in).  Row layout:
    #   0,1: gcn layer bias | 2: edge | 3: path | 4: pred hidden | 5: pred out
    p['b_slab'] = jnp.zeros((B_ROWS, W_COLS), F32)

    # NOTE: the bilinear Attention weights are mathematically dead (softmax over
    # a [M,1] tensor along dim=-1 is identically 1); not materialized.
    return p


# ----------------------------- host-side preprocessing -----------------------
def build_doc_adjacency():
    """Synthetic per-doc hetero mention graph (intra chain / inter / global)."""
    A = np.zeros((NUM_RELS, NODES_PER_DOC, NODES_PER_DOC), np.float32)
    for m in range(1, MENTION_NUM):                       # intra: chain
        A[0, m, m + 1] = 1.0
        A[0, m + 1, m] = 1.0
    A[1, 1, MENTION_NUM] = 1.0                            # inter: first <-> last
    A[1, MENTION_NUM, 1] = 1.0
    for m in range(1, MENTION_NUM + 1):                   # global: cls <-> mentions
        A[2, 0, m] = 1.0
        A[2, m, 0] = 1.0
    return A


def right_normalize(A):
    """GraphConv(norm='right'): divide aggregated messages by in-degree."""
    indeg = np.clip(A.sum(axis=-2), 1.0, None)            # [R, dst]
    return np.transpose(A, (0, 2, 1)) / indeg[:, :, None]


def build_host_slab(mention_id, e2m_table, h_t_pairs, relation_mask):
    """Pack every host-built selection/adjacency matrix into one [176,34] f32 slab."""
    slab = np.zeros((SLAB_ROWS, SLAB_COLS), np.float32)
    bsz = mention_id.shape[0]

    # mention pooling + cls select: [N_TOTAL, ENC_ROWS]
    for b in range(bsz):
        slab[OFF_SEL + b * NODES_PER_DOC, ENC_FLAT + b] = 1.0      # cls node <- appended row
        mention_num = int(mention_id[b].max())
        assert mention_num == MENTION_NUM
        for m in range(1, mention_num + 1):
            mask = (mention_id[b] == m).astype(np.float32)
            tot = max(float(mask.sum()), 1.0)
            slab[OFF_SEL + b * NODES_PER_DOC + m, b * SLEN:(b + 1) * SLEN] = mask / tot

    # block-diagonal right-normalized adjacency per relation
    A = right_normalize(build_doc_adjacency())                     # [3, ND, ND]
    for r, off in enumerate((OFF_A1, OFF_A2, OFF_A3)):
        for b in range(bsz):
            slab[off + b * NODES_PER_DOC:off + (b + 1) * NODES_PER_DOC,
                 b * NODES_PER_DOC:(b + 1) * NODES_PER_DOC] = A[r]

    # entity -> mention pooling (dummy row 0 of the table dropped, rows normalized)
    for b in range(bsz):
        sel = e2m_table[b, 1:, :].astype(np.float32)               # [ENT, ND]
        tot = np.clip(sel.sum(-1, keepdims=True), 1.0, None)
        slab[OFF_E2M + b * ENT_NUM:OFF_E2M + (b + 1) * ENT_NUM,
             b * NODES_PER_DOC:(b + 1) * NODES_PER_DOC] = sel / tot

    # head / tail one-hot gathers, per-pair global select, path count-matrices
    ht = h_t_pairs + (h_t_pairs == 0).astype(np.int64) - 1         # 0-pairs -> entity 0
    for b in range(bsz):
        for j in range(H_T_LIMIT):
            row = b * H_T_LIMIT + j
            slab[OFF_GH + row, b * ENT_NUM + int(ht[b, j, 0])] = 1.0
            slab[OFF_GT + row, b * ENT_NUM + int(ht[b, j, 1])] = 1.0
            slab[OFF_GSEL + row, b * NODES_PER_DOC] = 1.0          # doc's cls/global node
    for b in range(bsz):
        base = b * ENT_NUM * ENT_NUM
        for j in range(H_T_LIMIT):
            if relation_mask[b, j] == 0:
                break                                              # matches original 'break'
            h, t = int(ht[b, j, 0]), int(ht[b, j, 1])
            row = b * H_T_LIMIT + j
            for v in range(ENT_NUM):
                if v == h or v == t:
                    continue
                slab[OFF_PS0 + row, base + h * ENT_NUM + v] += 1.0   # forward_first  (h -> v)
                slab[OFF_PS1 + row, base + v * ENT_NUM + t] += 1.0   # forward_second (v -> t)
                slab[OFF_PS2 + row, base + t * ENT_NUM + v] += 1.0   # backward_first (t -> v)
                slab[OFF_PS3 + row, base + v * ENT_NUM + h] += 1.0   # backward_second(v -> h)

    # dense entity-graph edge endpoint selects (block-diagonal over docs)
    for b in range(bsz):
        for s in range(ENT_NUM):
            for t in range(ENT_NUM):
                e = b * ENT_NUM * ENT_NUM + s * ENT_NUM + t
                slab[OFF_SSRC + e, b * ENT_NUM + s] = 1.0
                slab[OFF_SDST + e, b * ENT_NUM + t] = 1.0
    return slab


# ----------------------------- forward (jitted) -------------------------------
@jax.jit
def gdgn_forward(params, words, entity_type, entity_id, host_slab):
    # "BERT" encoder stand-in + entity type / id embeddings
    enc = params['word_emb'][words]                               # [B, S, 24]
    type_e = params['entity_type_emb'][entity_type]
    id_e = params['entity_id_emb'][entity_id]
    encoder_outputs = jnp.concatenate([enc, type_e, id_e], axis=-1)   # [B, S, 32]

    bsz = words.shape[0]
    # cls rows = sentence_cls (BERT part only) zero-padded in the type/id dims,
    # appended to the flattened encoder rows (no separate cls_pad HBM array).
    cls_rows = jnp.concatenate(
        [enc[:, 0, :], jnp.zeros((bsz, ENTITY_TYPE_SIZE + ENTITY_ID_SIZE), F32)],
        axis=-1)                                                  # [B, 32]
    enc_ext = jnp.concatenate(
        [encoder_outputs.reshape(bsz * SLEN, GCN_DIM), cls_rows], axis=0)  # [34, 32]

    preds_flat = _FUSED_CALL(enc_ext, host_slab,
                             params['w_slab'], params['b_slab'])  # [B*H_T_LIMIT, 8]
    return preds_flat.reshape(bsz, H_T_LIMIT, RELATION_NUM)


# ----------------------------- main -------------------------------------------
if __name__ == "__main__":
    key = jax.random.PRNGKey(0)
    k_param, k_words, k_type = jax.random.split(key, 3)

    params = init_params(k_param)

    # deterministic inputs
    words = jax.random.randint(k_words, (BSZ, SLEN), 0, VOCAB, dtype=jnp.int32)
    entity_type = jax.random.randint(k_type, (BSZ, SLEN), 0, ENTITY_TYPE_NUM,
                                     dtype=jnp.int32)

    mention_id = np.zeros((BSZ, SLEN), np.int32)
    entity_id = np.zeros((BSZ, SLEN), np.int32)
    for b in range(BSZ):
        for m in range(MENTION_NUM):
            mention_id[b, 1 + 2 * m] = m + 1
            mention_id[b, 2 + 2 * m] = m + 1
        for e in range(ENT_NUM):
            entity_id[b, 1 + 2 * e] = e + 1
            entity_id[b, 2 + 2 * e] = e + 1

    e2m = np.zeros((BSZ, ENT_NUM + 1, MENTION_NUM + 1), np.float32)
    for b in range(BSZ):
        for m in range(1, MENTION_NUM + 1):
            e2m[b, ((m - 1) % ENT_NUM) + 1, m] = 1.0

    h_t_pairs = np.array([[[1, 2], [1, 3], [2, 3], [0, 0]],
                          [[1, 2], [2, 3], [0, 0], [0, 0]]], np.int64)
    relation_mask = np.array([[1, 1, 1, 0],
                              [1, 1, 0, 0]], np.int64)

    # host-side graph / path-table preprocessing (mirrors the DGL + dict lookups
    # the original performs on the host), packed into ONE slab / ONE DMA
    host_slab = jnp.asarray(
        build_host_slab(mention_id, e2m, h_t_pairs, relation_mask))

    preds = gdgn_forward(params, words, entity_type,
                         jnp.asarray(entity_id, jnp.int32), host_slab)
    preds = jax.block_until_ready(preds)

    assert preds.shape == (BSZ, H_T_LIMIT, RELATION_NUM)
    assert bool(jnp.all(jnp.isfinite(preds)))
    print("KERNEL_OK")
</pallas_src>

<mosaic_0001>
module attributes {stable_mosaic.version = 11 : i64} {
  func.func @_fused_kernel(%arg0: i32, %arg1: memref<34x32xf32, #tpu.memory_space<vmem>>, %arg2: memref<176x34xf32, #tpu.memory_space<vmem>>, %arg3: memref<1248x192xbf16, #tpu.memory_space<vmem>>, %arg4: memref<8x192xf32, #tpu.memory_space<vmem>>, %arg5: memref<8x8xf32, #tpu.memory_space<vmem>>) attributes {dimension_semantics = [#tpu.dimension_semantics<arbitrary>], iteration_bounds = array<i64: 1>, scalar_prefetch = 0 : i64, scratch_operands = 0 : i64, tpu.core_type = #tpu.core_type<tc>, window_params = [{pipeline_mode = #tpu.pipeline_mode<synchronous>, transform_indices = @transform_0, window_bounds = array<i64: 34, 32>}, {pipeline_mode = #tpu.pipeline_mode<synchronous>, transform_indices = @transform_1, window_bounds = array<i64: 176, 34>}, {pipeline_mode = #tpu.pipeline_mode<synchronous>, transform_indices = @transform_2, window_bounds = array<i64: 1248, 192>}, {pipeline_mode = #tpu.pipeline_mode<synchronous>, transform_indices = @transform_3, window_bounds = array<i64: 8, 192>}, {pipeline_mode = #tpu.pipeline_mode<synchronous>, transform_indices = @transform_4, window_bounds = array<i64: 8, 8>}]} {
    %c0 = arith.constant 0 : index
    %c0_0 = arith.constant 0 : index
    %0 = vector.load %arg1[%c0, %c0_0] : memref<34x32xf32, #tpu.memory_space<vmem>>, vector<34x32xf32>
    %c0_1 = arith.constant 0 : index
    %c0_2 = arith.constant 0 : index
    %1 = vector.load %arg2[%c0_1, %c0_2] : memref<176x34xf32, #tpu.memory_space<vmem>>, vector<10x34xf32>
    %cst = arith.constant dense<0.000000e+00> : vector<10x32xf32>
    %2 = tpu.matmul %1, %0, %cst {dimension_numbers = #tpu.dot_dimension_numbers<[1], [0], [0], [1], [0, 0, 1, 1], [], []>} : vector<10x34xf32>, vector<34x32xf32>, vector<10x32xf32> -> vector<10x32xf32>
    %c16 = arith.constant 16 : index
    %c0_3 = arith.constant 0 : index
    %3 = vector.load %arg2[%c16, %c0_3] : memref<176x34xf32, #tpu.memory_space<vmem>>, vector<10x10xf32>
    %c32 = arith.constant 32 : index
    %c0_4 = arith.constant 0 : index
    %4 = vector.load %arg2[%c32, %c0_4] : memref<176x34xf32, #tpu.memory_space<vmem>>, vector<10x10xf32>
    %c48 = arith.constant 48 : index
    %c0_5 = arith.constant 0 : index
    %5 = vector.load %arg2[%c48, %c0_5] : memref<176x34xf32, #tpu.memory_space<vmem>>, vector<10x10xf32>
    %cst_6 = arith.constant dense<0.000000e+00> : vector<10x32xf32>
    %6 = tpu.matmul %3, %2, %cst_6 {dimension_numbers = #tpu.dot_dimension_numbers<[1], [0], [0], [1], [0, 0, 1, 1], [], []>} : vector<10x10xf32>, vector<10x32xf32>, vector<10x32xf32> -> vector<10x32xf32>
    %cst_7 = arith.constant dense<0.000000e+00> : vector<10x32xf32>
    %7 = tpu.matmul %4, %2, %cst_7 {dimension_numbers = #tpu.dot_dimension_numbers<[1], [0], [0], [1], [0, 0, 1, 1], [], []>} : vector<10x10xf32>, vector<10x32xf32>, vector<10x32xf32> -> vector<10x32xf32>
    %cst_8 = arith.constant dense<0.000000e+00> : vector<10x32xf32>
    %8 = tpu.matmul %5, %2, %cst_8 {dimension_numbers = #tpu.dot_dimension_numbers<[1], [0], [0], [1], [0, 0, 1, 1], [], []>} : vector<10x10xf32>, vector<10x32xf32>, vector<10x32xf32> -> vector<10x32xf32>
    %9 = tpu.concatenate %2, %6, %7, %8 in 1 : vector<10x32xf32>, vector<10x32xf32>, vector<10x32xf32>, vector<10x32xf32> -> vector<10x128xf32>
    %c0_9 = arith.constant 0 : index
    %c0_10 = arith.constant 0 : index
    %10 = vector.load %arg3[%c0_9, %c0_10] : memref<1248x192xbf16, #tpu.memory_space<vmem>>, vector<128x32xbf16>
    %11 = arith.truncf %9 : vector<10x128xf32> to vector<10x128xbf16>
    %cst_11 = arith.constant dense<0.000000e+00> : vector<10x32xf32>
    %12 = tpu.matmul %11, %10, %cst_11 {dimension_numbers = #tpu.dot_dimension_numbers<[1], [0], [0], [1], [0, 0, 1, 1], [], []>} : vector<10x128xbf16>, vector<128x32xbf16>, vector<10x32xf32> -> vector<10x32xf32>
    %c0_12 = arith.constant 0 : index
    %c0_13 = arith.constant 0 : index
    %13 = vector.load %arg4[%c0_12, %c0_13] : memref<8x192xf32, #tpu.memory_space<vmem>>, vector<1x32xf32>
    %14 = vector.broadcast %13 : vector<1x32xf32> to vector<10x32xf32>
    %15 = arith.addf %12, %14 : vector<10x32xf32>
    %16 = math.tanh %15 : vector<10x32xf32>
    %cst_14 = arith.constant dense<0.000000e+00> : vector<10x32xf32>
    %17 = tpu.matmul %3, %16, %cst_14 {dimension_numbers = #tpu.dot_dimension_numbers<[1], [0], [0], [1], [0, 0, 1, 1], [], []>} : vector<10x10xf32>, vector<10x32xf32>, vector<10x32xf32> -> vector<10x32xf32>
    %cst_15 = arith.constant dense<0.000000e+00> : vector<10x32xf32>
    %18 = tpu.matmul %4, %16, %cst_15 {dimension_numbers = #tpu.dot_dimension_numbers<[1], [0], [0], [1], [0, 0, 1, 1], [], []>} : vector<10x10xf32>, vector<10x32xf32>, vector<10x32xf32> -> vector<10x32xf32>
    %cst_16 = arith.constant dense<0.000000e+00> : vector<10x32xf32>
    %19 = tpu.matmul %5, %16, %cst_16 {dimension_numbers = #tpu.dot_dimension_numbers<[1], [0], [0], [1], [0, 0, 1, 1], [], []>} : vector<10x10xf32>, vector<10x32xf32>, vector<10x32xf32> -> vector<10x32xf32>
    %20 = tpu.concatenate %16, %17, %18, %19 in 1 : vector<10x32xf32>, vector<10x32xf32>, vector<10x32xf32>, vector<10x32xf32> -> vector<10x128xf32>
    %c128 = arith.constant 128 : index
    %c0_17 = arith.constant 0 : index
    %21 = vector.load %arg3[%c128, %c0_17] : memref<1248x192xbf16, #tpu.memory_space<vmem>>, vector<128x32xbf16>
    %22 = arith.truncf %20 : vector<10x128xf32> to vector<10x128xbf16>
    %cst_18 = arith.constant dense<0.000000e+00> : vector<10x32xf32>
    %23 = tpu.matmul %22, %21, %cst_18 {dimension_numbers = #tpu.dot_dimension_numbers<[1], [0], [0], [1], [0, 0, 1, 1], [], []>} : vector<10x128xbf16>, vector<128x32xbf16>, vector<10x32xf32> -> vector<10x32xf32>
    %c1 = arith.constant 1 : index
    %c0_19 = arith.constant 0 : index
    %24 = vector.load %arg4[%c1, %c0_19] : memref<8x192xf32, #tpu.memory_space<vmem>>, vector<1x32xf32>
    %25 = vector.broadcast %24 : vector<1x32xf32> to vector<10x32xf32>
    %26 = arith.addf %23, %25 : vector<10x32xf32>
    %27 = math.tanh %26 : vector<10x32xf32>
    %28 = tpu.concatenate %2, %16, %27 in 1 : vector<10x32xf32>, vector<10x32xf32>, vector<10x32xf32> -> vector<10x96xf32>
    %c64 = arith.constant 64 : index
    %c0_20 = arith.constant 0 : index
    %29 = vector.load %arg2[%c64, %c0_20] : memref<176x34xf32, #tpu.memory_space<vmem>>, vector<6x10xf32>
    %cst_21 = arith.constant dense<0.000000e+00> : vector<6x96xf32>
    %30 = tpu.matmul %29, %28, %cst_21 {dimension_numbers = #tpu.dot_dimension_numbers<[1], [0], [0], [1], [0, 0, 1, 1], [], []>} : vector<6x10xf32>, vector<10x96xf32>, vector<6x96xf32> -> vector<6x96xf32>
    %31 = vector.extract_strided_slice %30 {offsets = [0, 64], sizes = [6, 32], strides = [1, 1]} : vector<6x96xf32> to vector<6x32xf32>
    %c128_22 = arith.constant 128 : index
    %c0_23 = arith.constant 0 : index
    %32 = vector.load %arg2[%c128_22, %c0_23] : memref<176x34xf32, #tpu.memory_space<vmem>>, vector<18x6xf32>
    %c152 = arith.constant 152 : index
    %c0_24 = arith.constant 0 : index
    %33 = vector.load %arg2[%c152, %c0_24] : memref<176x34xf32, #tpu.memory_space<vmem>>, vector<18x6xf32>
    %cst_25 = arith.constant dense<0.000000e+00> : vector<18x32xf32>
    %34 = tpu.matmul %32, %31, %cst_25 {dimension_numbers = #tpu.dot_dimension_numbers<[1], [0], [0], [1], [0, 0, 1, 1], [], []>} : vector<18x6xf32>, vector<6x32xf32>, vector<18x32xf32> -> vector<18x32xf32>
    %cst_26 = arith.constant dense<0.000000e+00> : vector<18x32xf32>
    %35 = tpu.matmul %33, %31, %cst_26 {dimension_numbers = #tpu.dot_dimension_numbers<[1], [0], [0], [1], [0, 0, 1, 1], [], []>} : vector<18x6xf32>, vector<6x32xf32>, vector<18x32xf32> -> vector<18x32xf32>
    %36 = tpu.concatenate %34, %35 in 1 : vector<18x32xf32>, vector<18x32xf32> -> vector<18x64xf32>
    %c256 = arith.constant 256 : index
    %c0_27 = arith.constant 0 : index
    %37 = vector.load %arg3[%c256, %c0_27] : memref<1248x192xbf16, #tpu.memory_space<vmem>>, vector<64x32xbf16>
    %38 = arith.truncf %36 : vector<18x64xf32> to vector<18x64xbf16>
    %cst_28 = arith.constant dense<0.000000e+00> : vector<18x32xf32>
    %39 = tpu.matmul %38, %37, %cst_28 {dimension_numbers = #tpu.dot_dimension_numbers<[1], [0], [0], [1], [0, 0, 1, 1], [], []>} : vector<18x64xbf16>, vector<64x32xbf16>, vector<18x32xf32> -> vector<18x32xf32>
    %c2 = arith.constant 2 : index
    %c0_29 = arith.constant 0 : index
    %40 = vector.load %arg4[%c2, %c0_29] : memref<8x192xf32, #tpu.memory_space<vmem>>, vector<1x32xf32>
    %41 = vector.broadcast %40 : vector<1x32xf32> to vector<18x32xf32>
    %42 = arith.addf %39, %41 : vector<18x32xf32>
    %43 = math.tanh %42 : vector<18x32xf32>
    %c96 = arith.constant 96 : index
    %c0_30 = arith.constant 0 : index
    %44 = vector.load %arg2[%c96, %c0_30] : memref<176x34xf32, #tpu.memory_space<vmem>>, vector<8x18xf32>
    %c104 = arith.constant 104 : index
    %c0_31 = arith.constant 0 : index
    %45 = vector.load %arg2[%c104, %c0_31] : memref<176x34xf32, #tpu.memory_space<vmem>>, vector<8x18xf32>
    %c112 = arith.constant 112 : index
    %c0_32 = arith.constant 0 : index
    %46 = vector.load %arg2[%c112, %c0_32] : memref<176x34xf32, #tpu.memory_space<vmem>>, vector<8x18xf32>
    %c120 = arith.constant 120 : index
    %c0_33 = arith.constant 0 : index
    %47 = vector.load %arg2[%c120, %c0_33] : memref<176x34xf32, #tpu.memory_space<vmem>>, vector<8x18xf32>
    %cst_34 = arith.constant dense<0.000000e+00> : vector<8x32xf32>
    %48 = tpu.matmul %44, %43, %cst_34 {dimension_numbers = #tpu.dot_dimension_numbers<[1], [0], [0], [1], [0, 0, 1, 1], [], []>} : vector<8x18xf32>, vector<18x32xf32>, vector<8x32xf32> -> vector<8x32xf32>
    %cst_35 = arith.constant dense<0.000000e+00> : vector<8x32xf32>
    %49 = tpu.matmul %45, %43, %cst_35 {dimension_numbers = #tpu.dot_dimension_numbers<[1], [0], [0], [1], [0, 0, 1, 1], [], []>} : vector<8x18xf32>, vector<18x32xf32>, vector<8x32xf32> -> vector<8x32xf32>
    %cst_36 = arith.constant dense<0.000000e+00> : vector<8x32xf32>
    %50 = tpu.matmul %46, %43, %cst_36 {dimension_numbers = #tpu.dot_dimension_numbers<[1], [0], [0], [1], [0, 0, 1, 1], [], []>} : vector<8x18xf32>, vector<18x32xf32>, vector<8x32xf32> -> vector<8x32xf32>
    %cst_37 = arith.constant dense<0.000000e+00> : vector<8x32xf32>
    %51 = tpu.matmul %47, %43, %cst_37 {dimension_numbers = #tpu.dot_dimension_numbers<[1], [0], [0], [1], [0, 0, 1, 1], [], []>} : vector<8x18xf32>, vector<18x32xf32>, vector<8x32xf32> -> vector<8x32xf32>
    %52 = tpu.concatenate %48, %49, %50, %51 in 1 : vector<8x32xf32>, vector<8x32xf32>, vector<8x32xf32>, vector<8x32xf32> -> vector<8x128xf32>
    %c320 = arith.constant 320 : index
    %c0_38 = arith.constant 0 : index
    %53 = vector.load %arg3[%c320, %c0_38] : memref<1248x192xbf16, #tpu.memory_space<vmem>>, vector<128x128xbf16>
    %54 = arith.truncf %52 : vector<8x128xf32> to vector<8x128xbf16>
    %cst_39 = arith.constant dense<0.000000e+00> : vector<8x128xf32>
    %55 = tpu.matmul %54, %53, %cst_39 {dimension_numbers = #tpu.dot_dimension_numbers<[1], [0], [0], [1], [0, 0, 1, 1], [], []>} : vector<8x128xbf16>, vector<128x128xbf16>, vector<8x128xf32> -> vector<8x128xf32>
    %c3 = arith.constant 3 : index
    %c0_40 = arith.constant 0 : index
    %56 = vector.load %arg4[%c3, %c0_40] : memref<8x192xf32, #tpu.memory_space<vmem>>, vector<1x128xf32>
    %57 = vector.broadcast %56 : vector<1x128xf32> to vector<8x128xf32>
    %58 = arith.addf %55, %57 : vector<8x128xf32>
    %59 = math.tanh %58 : vector<8x128xf32>
    %c72 = arith.constant 72 : index
    %c0_41 = arith.constant 0 : index
    %60 = vector.load %arg2[%c72, %c0_41] : memref<176x34xf32, #tpu.memory_space<vmem>>, vector<8x6xf32>
    %c80 = arith.constant 80 : index
    %c0_42 = arith.constant 0 : index
    %61 = vector.load %arg2[%c80, %c0_42] : memref<176x34xf32, #tpu.memory_space<vmem>>, vector<8x6xf32>
    %c88 = arith.constant 88 : index
    %c0_43 = arith.constant 0 : index
    %62 = vector.load %arg2[%c88, %c0_43] : memref<176x34xf32, #tpu.memory_space<vmem>>, vector<8x10xf32>
    %cst_44 = arith.constant dense<0.000000e+00> : vector<8x96xf32>
    %63 = tpu.matmul %60, %30, %cst_44 {dimension_numbers = #tpu.dot_dimension_numbers<[1], [0], [0], [1], [0, 0, 1, 1], [], []>} : vector<8x6xf32>, vector<6x96xf32>, vector<8x96xf32> -> vector<8x96xf32>
    %cst_45 = arith.constant dense<0.000000e+00> : vector<8x96xf32>
    %64 = tpu.matmul %61, %30, %cst_45 {dimension_numbers = #tpu.dot_dimension_numbers<[1], [0], [0], [1], [0, 0, 1, 1], [], []>} : vector<8x6xf32>, vector<6x96xf32>, vector<8x96xf32> -> vector<8x96xf32>
    %cst_46 = arith.constant dense<0.000000e+00> : vector<8x96xf32>
    %65 = tpu.matmul %62, %28, %cst_46 {dimension_numbers = #tpu.dot_dimension_numbers<[1], [0], [0], [1], [0, 0, 1, 1], [], []>} : vector<8x10xf32>, vector<10x96xf32>, vector<8x96xf32> -> vector<8x96xf32>
    %66 = arith.subf %63, %64 : vector<8x96xf32>
    %67 = math.absf %66 : vector<8x96xf32>
    %68 = arith.mulf %63, %64 : vector<8x96xf32>
    %69 = tpu.concatenate %63, %64, %67, %68, %65, %59 in 1 : vector<8x96xf32>, vector<8x96xf32>, vector<8x96xf32>, vector<8x96xf32>, vector<8x96xf32>, vector<8x128xf32> -> vector<8x608xf32>
    %c448 = arith.constant 448 : index
    %c0_47 = arith.constant 0 : index
    %70 = vector.load %arg3[%c448, %c0_47] : memref<1248x192xbf16, #tpu.memory_space<vmem>>, vector<608x192xbf16>
    %71 = arith.truncf %69 : vector<8x608xf32> to vector<8x608xbf16>
    %cst_48 = arith.constant dense<0.000000e+00> : vector<8x192xf32>
    %72 = tpu.matmul %71, %70, %cst_48 {dimension_numbers = #tpu.dot_dimension_numbers<[1], [0], [0], [1], [0, 0, 1, 1], [], []>} : vector<8x608xbf16>, vector<608x192xbf16>, vector<8x192xf32> -> vector<8x192xf32>
    %c4 = arith.constant 4 : index
    %c0_49 = arith.constant 0 : index
    %73 = vector.load %arg4[%c4, %c0_49] : memref<8x192xf32, #tpu.memory_space<vmem>>, vector<1x192xf32>
    %74 = vector.broadcast %73 : vector<1x192xf32> to vector<8x192xf32>
    %75 = arith.addf %72, %74 : vector<8x192xf32>
    %76 = math.tanh %75 : vector<8x192xf32>
    %c1056 = arith.constant 1056 : index
    %c0_50 = arith.constant 0 : index
    %77 = vector.load %arg3[%c1056, %c0_50] : memref<1248x192xbf16, #tpu.memory_space<vmem>>, vector<192x8xbf16>
    %78 = arith.truncf %76 : vector<8x192xf32> to vector<8x192xbf16>
    %cst_51 = arith.constant dense<0.000000e+00> : vector<8x8xf32>
    %79 = tpu.matmul %78, %77, %cst_51 {dimension_numbers = #tpu.dot_dimension_numbers<[1], [0], [0], [1], [0, 0, 1, 1], [], []>} : vector<8x192xbf16>, vector<192x8xbf16>, vector<8x8xf32> -> vector<8x8xf32>
    %c5 = arith.constant 5 : index
    %c0_52 = arith.constant 0 : index
    %80 = vector.load %arg4[%c5, %c0_52] : memref<8x192xf32, #tpu.memory_space<vmem>>, vector<1x8xf32>
    %81 = vector.broadcast %80 : vector<1x8xf32> to vector<8x8xf32>
    %82 = arith.addf %79, %81 : vector<8x8xf32>
    %c0_53 = arith.constant 0 : index
    %c0_54 = arith.constant 0 : index
    %83 = vector.load %arg5[%c0_53, %c0_54] : memref<8x8xf32, #tpu.memory_space<vmem>>, vector<8x8xf32>
    tpu.vector_store %arg5[%c0_53, %c0_54], %82 {strides = array<i32>} : memref<8x8xf32, #tpu.memory_space<vmem>>, vector<8x8xf32>,
    return
  }
  func.func @transform_0(%arg0: i32) -> (i32, i32) {
    %c0_i32 = arith.constant 0 : i32
    %c0_i32_0 = arith.constant 0 : i32
    %c0_i32_1 = arith.constant 0 : i32
    return %c0_i32, %c0_i32_0 : i32, i32
  }
  func.func @transform_1(%arg0: i32) -> (i32, i32) {
    %c0_i32 = arith.constant 0 : i32
    %c0_i32_0 = arith.constant 0 : i32
    %c0_i32_1 = arith.constant 0 : i32
    return %c0_i32, %c0_i32_0 : i32, i32
  }
  func.func @transform_2(%arg0: i32) -> (i32, i32) {
    %c0_i32 = arith.constant 0 : i32
    %c0_i32_0 = arith.constant 0 : i32
    %c0_i32_1 = arith.constant 0 : i32
    return %c0_i32, %c0_i32_0 : i32, i32
  }
  func.func @transform_3(%arg0: i32) -> (i32, i32) {
    %c0_i32 = arith.constant 0 : i32
    %c0_i32_0 = arith.constant 0 : i32
    %c0_i32_1 = arith.constant 0 : i32
    return %c0_i32, %c0_i32_0 : i32, i32
  }
  func.func @transform_4(%arg0: i32) -> (i32, i32) {
    %c0_i32 = arith.constant 0 : i32
    %c0_i32_0 = arith.constant 0 : i32
    %c0_i32_1 = arith.constant 0 : i32
    return %c0_i32, %c0_i32_0 : i32, i32
  }
}

</mosaic_0001>

<bundles_post_ra>
// kernel: gdgn_forward.1
= control target key start
LH: loop header
LB: loop body
LE: loop exit
PB: predicated region body
PF: predicated region fallthrough
CT: control target
= control target key end

     0   :  { %vm33_vm0 = vcmask 1041408   ;;  %vm26_vm1 = vcmask 277504   ;;  %s4155_s0 = inlined_call_operand.vmem [shape: f32[34,32], index: 0, kind: input, shape index: {}]   ;;  %s4156_s1 = inlined_call_operand.vmem [shape: f32[176,34], index: 1, kind: input, shape index: {}]   ;;  %s4157_s2 = inlined_call_operand.vmem [shape: bf16[1248,192], index: 2, kind: input, shape index: {}]   ;;  %s4158_s3 = inlined_call_operand.vmem [shape: f32[8,192], index: 3, kind: input, shape index: {}]   ;;  %s4159_s4 = inlined_call_operand.hbm [shape: f32[8,8], index: 4, kind: output, shape index: {}]  }
   0x1   :  { %v23_v0 = vld [vmem:[%s4155_s0 + $0x20] sm:$0x3]  ;;  %v22_v1 = vld [vmem:[%s4155_s0 + $0x18] sm:$0xff]  ;;  %v21_v2 = vld [vmem:[%s4155_s0 + $0x10] sm:$0xff] }
   0x2   :  { %2961 = vmatprep.subr.msk.mxu0 %vm33_vm0, %v23_v0  ;;  %v24_v3 = vld [vmem:[%s4156_s1] sm:$0xff]  ;;  %v20_v4 = vld [vmem:[%s4155_s0 + $0x8] sm:$0xff] }
   0x3   :  { %2962 = vmatpush3.msk.msra.mxu0 %vm33_vm0, %v23_v0  ;;  %2971 = vmatprep.mubr.msk.f32.mxu0 %vm26_vm1, %v24_v3  ;;  %v19_v5 = vld [vmem:[%s4155_s0] sm:$0xff]  ;;  %v25_v6 = vld [vmem:[%s4156_s1 + $0x8] sm:$0x3] }
   0x4   :  { %2963 = vmatprep.subr.mxu0 %v22_v1 }
   0x5   :  { %2964 = vmatpush3.msra.mxu0 %v22_v1 }
   0x6   :  { %2965 = vmatprep.subr.mxu0 %v21_v2 }
   0x7   :  { %2966 = vmatpush3.msra.mxu0 %v21_v2 }
   0x8   :  { %2967 = vmatprep.subr.mxu0 %v20_v4 }
   0x9   :  { %2968 = vmatpush3.msra.mxu0 %v20_v4 }
   0xa   :  { %2969 = vmatprep.subr.mxu0 %v19_v5 }
   0xb   :  { %2970 = vmatpush3.msra.mxu0 %v19_v5 }
   0xc   :  { %2972 = vmatmul.mubr.msk.f32.vlgmr.msra.gmra.mxu0 %vm26_vm1, %v25_v6 }
   0xd   :  { %9 = vsyncpa [#allocation3], 0  ;;  %v112_v7 = vld [vmem:[%s4156_s1 + $0x10] sm:$0xff]  ;;  %vm118_vm2 = vcmask 80896   ;;  %v3471_v8 = vld [vmem:[%s4156_s1 + $0x20] sm:$0xff]  ;;  %v3408_v16 = vmov 0.0  }
   0xe   :  { %2978 = vmatprep.mubr.msk.f32.mxu0 %vm118_vm2, %v112_v7  ;;  %2985 = vmatprep.mubr.msk.f32.mxu1 %vm118_vm2, %v3471_v8  ;;  %v3491_v11 = vld [vmem:[%s4156_s1 + $0x18] sm:$0x3]  ;;  %v3496_v12 = vld [vmem:[%s4156_s1 + $0x28] sm:$0x3]  ;;  %v3503_v13 = vld [vmem:[%s4156_s1 + $0x30] sm:$0xff]  ;;  %vm3409_vm3 = vmmov 0  }
   0xf   :  { %v3520_v14 = vld [vmem:[%s4156_s1 + $0x38] sm:$0x3]  ;;  %v3213_v17 = vld [vmem:[%s4157_s2 + $0x60] ss:$8 sps:$4 sm:$0xff]   ;;  %s3410_s30 = smov 32   ;;  %s3411_s5 = smov 64  }
  0x10   :  { %v3212_v15 = vld [vmem:[%s4157_s2 + $0x70] ss:$8 sps:$4 sm:$0xff]   ;;  %v3215_v19 = vld [vmem:[%s4157_s2 + $0x40] ss:$8 sps:$4 sm:$0xff]   ;;  %s3412_s0 = smov 96   ;;  %vm389_vm4 = vcmask 261120  }
  0x11   :  { %v3214_v18 = vld [vmem:[%s4157_s2 + $0x50] ss:$8 sps:$4 sm:$0xff]   ;;  %v3217_v21 = vld [vmem:[%s4157_s2 + $0x20] ss:$8 sps:$4 sm:$0xff]   ;;  %vm392_vm5 = vcmask 523264   ;;  %vm395_vm6 = vcmask 785408  }
  0x12   :  { %v3216_v20 = vld [vmem:[%s4157_s2 + $0x30] ss:$8 sps:$4 sm:$0xff]   ;;  %v3219_v23 = vld [vmem:[%s4157_s2] ss:$8 sps:$4 sm:$0xff]   ;;  %vm989_vm7 = vcmask 1045504   ;;  %vm979_vm8 = vcmask 48128  }
  0x13   :  { %v3218_v22 = vld [vmem:[%s4157_s2 + $0x10] ss:$8 sps:$4 sm:$0xff]   ;;  %v415_v50 = vld [vmem:[%s4158_s3] ss:$0 sm:$0xff]  ;;  %vm1272_vm9 = vcmask 146432   ;;  %s3414_s25 = smov [#allocation2]  }
  0x14   :  { %v3220_v58 = vld [vmem:[%s4157_s2 + $0xf0] ss:$8 sps:$4 sm:$0xff]   ;;  %v3221_v59 = vld [vmem:[%s4157_s2 + $0xe0] ss:$8 sps:$4 sm:$0xff]   ;;  %s2689_s26 = sshll.u32 %s3414_s25, 4  ;;  %vm2681_vm10 = vcmask 64512   ;;  %s2690_s26 = int_to_ptr.vmem [resolvable:$true] %s2689_s26 }
  0x15   :  { %v3222_v60 = vld [vmem:[%s4157_s2 + $0xd0] ss:$8 sps:$4 sm:$0xff]   ;;  %v3223_v61 = vld [vmem:[%s4157_s2 + $0xc0] ss:$8 sps:$4 sm:$0xff]   ;;  %s3386_s27 = scalar_lea.vmem %s2690_s26, 128  ;;  %p3391_p1 = scmp.lt.s32.totalorder %s2690_s26, %s2690_s26 }
  0x16   :  { %v3224_v62 = vld [vmem:[%s4157_s2 + $0xb0] ss:$8 sps:$4 sm:$0xff]   ;;  %v3225_v63 = vld [vmem:[%s4157_s2 + $0xa0] ss:$8 sps:$4 sm:$0xff]   ;;  %p3387_p0 = scmp.ne.s32.totalorder %s2690_s26, %s3386_s27  ;;  %p3392_p2 = scmp.lt.s32.totalorder %s3386_s27, %s3386_s27 }
  0x17   :  { %v3226_v0 = vld [vmem:[%s4157_s2 + $0x90] ss:$8 sps:$4 sm:$0xff]   ;;  %v3227_v2 = vld [vmem:[%s4157_s2 + $0x80] ss:$8 sps:$4 sm:$0xff]  }
  0x18   :  { %p3393_p3 = por %p3392_p2, %p3391_p1 }
  0x1a   :  { %p3394_p4 = pnand %p3393_p3, %p3387_p0 }
  0xcc   :  { %v3476_v9 = vpop.f32.mrf.mxu0 }
  0xcd   :  { %2974 = vmatprep.subr.msk.mxu0 %vm33_vm0, %v3476_v9  ;;  %2981 = vmatprep.subr.msk.mxu1 %vm33_vm0, %v3476_v9 }
  0xce   :  { %v3482_v10 = vpop.f32.mrf.mxu0  ;;  %2975 = vmatpush3.msk.msra.mxu0 %vm33_vm0, %v3476_v9  ;;  %2982 = vmatpush3.msk.msra.mxu1 %vm33_vm0, %v3476_v9 }
  0xcf   :  { %2976 = vmatprep.subr.mxu0 %v3482_v10  ;;  %2983 = vmatprep.subr.mxu1 %v3482_v10 }
  0xd0   :  { %2977 = vmatpush3.msra.mxu0 %v3482_v10  ;;  %2984 = vmatpush3.msra.mxu1 %v3482_v10 }
  0xd1   :  { %2979 = vmatmul.mubr.msk.f32.vlgmr.msra.gmra.mxu0 %vm118_vm2, %v3491_v11  ;;  %2986 = vmatmul.mubr.msk.f32.vlgmr.msra.gmra.mxu1 %vm118_vm2, %v3496_v12 }
  0xd2   :  { %2988 = vmatprep.subr.msk.mxu1 %vm33_vm0, %v3476_v9  ;;  %2992 = vmatprep.mubr.msk.f32.mxu1 %vm118_vm2, %v3503_v13 }
  0xd3   :  { %2989 = vmatpush3.msk.msra.mxu1 %vm33_vm0, %v3476_v9  ;;  %2995 = vmatprep.subr.bf16.mxu0 %v3408_v16 }
  0xd4   :  { %2990 = vmatprep.subr.mxu1 %v3482_v10  ;;  %2996 = vmatpush3.bf16.msra.mxu0 %v3212_v15 }
  0xd5   :  { %2991 = vmatpush3.msra.mxu1 %v3482_v10  ;;  %2997 = vmatprep.subr.bf16.mxu0 %v3408_v16 }
  0xd6   :  { %2993 = vmatmul.mubr.msk.f32.vlgmr.msra.gmra.mxu1 %vm118_vm2, %v3520_v14  ;;  %3011 = vmatprep.mubr.msk.bf16.mxu0 %vm3409_vm3, %v3408_v16 }
  0xd7   :  { %3019 = vmatprep.mubr.msk.f32.mxu1 %vm118_vm2, %v112_v7 }
  0xd8   :  { %2998 = vmatpush3.bf16.msra.mxu0 %v3213_v17 }
  0xd9   :  { %2999 = vmatprep.subr.bf16.mxu0 %v3408_v16 }
  0xdc   :  { %3000 = vmatpush3.bf16.msra.mxu0 %v3214_v18 }
  0xdd   :  { %3001 = vmatprep.subr.bf16.mxu0 %v3408_v16 }
  0xe0   :  { %3002 = vmatpush3.bf16.msra.mxu0 %v3215_v19 }
  0xe1   :  { %3003 = vmatprep.subr.bf16.mxu0 %v3408_v16 }
  0xe4   :  { %3004 = vmatpush3.bf16.msra.mxu0 %v3216_v20 }
  0xe5   :  { %3005 = vmatprep.subr.bf16.mxu0 %v3408_v16 }
  0xe8   :  { %3006 = vmatpush3.bf16.msra.mxu0 %v3217_v21 }
  0xe9   :  { %3007 = vmatprep.subr.bf16.mxu0 %v3408_v16 }
  0xec   :  { %3008 = vmatpush3.bf16.msra.mxu0 %v3218_v22 }
  0xed   :  { %3009 = vmatprep.subr.bf16.mxu0 %v3408_v16 }
  0xf0   :  { %3010 = vmatpush3.bf16.msra.mxu0 %v3219_v23 }
  0xf1   :  { %3056 = vmatprep.subr.mxu0 %v3408_v16 }
 0x191   :  { %v2980_v24 = vpop.f32.mrf.mxu0  ;;  %v2987_v25 = vpop.f32.mrf.mxu1 }
 0x193   :  { %v194_v26 = vpop.f32.mrf.mxu0  ;;  %v275_v27 = vpop.f32.mrf.mxu1 }
 0x194   :  { %v3177_v28 = vpack.i.bf16 %v2980_v24, %v194_v26  ;;  %v3182_v30 = vpack.i.bf16 %v2987_v25, %v275_v27 }
 0x196   :  { %v2994_v29 = vpop.f32.mrf.mxu1  ;;  %3178 = vrot.lane.b32.xlu0 %v3177_v28, %s3410_s30 }
 0x198   :  { %v356_v31 = vpop.f32.mrf.mxu1 }
 0x199   :  { %v3187_v32 = vpack.i.bf16 %v2994_v29, %v356_v31 }
 0x19a   :  { %3183 = vrot.lane.b32.xlu0 %v3182_v30, %s3411_s5 }
 0x19b   :  { %3188 = vrot.lane.b32.xlu1 %v3187_v32, %s3412_s0  ;;  %v782_v32 = vld [vmem:[%s4158_s3 + $0x1] ss:$0 sm:$0xff] }
 0x208   :  { %v3179_v33 = vpop.permute.xlu0 %3178 }
 0x209   :  { %v3181_v34 = vunpack.i.h.bf16 %v3179_v33  ;;  %v3180_v35 = vunpack.i.l.bf16 %v3179_v33 }
 0x20b   :  { %v391_v40 = vsel %vm389_vm4, %v3476_v9, %v3181_v34  ;;  %v390_v41 = vsel %vm389_vm4, %v3482_v10, %v3180_v35 }
 0x20c   :  { %v3184_v36 = vpop.permute.xlu0 %3183 }
 0x20d   :  { %v3189_v37 = vpop.permute.xlu1 %3188  ;;  %v3186_v38 = vunpack.i.h.bf16 %v3184_v36  ;;  %v3185_v39 = vunpack.i.l.bf16 %v3184_v36 }
 0x20e   :  { %v3191_v42 = vunpack.i.h.bf16 %v3189_v37  ;;  %v3190_v43 = vunpack.i.l.bf16 %v3189_v37 }
 0x20f   :  { %v393_v44 = vsel %vm392_vm5, %v390_v41, %v3185_v39  ;;  %v394_v45 = vsel %vm392_vm5, %v391_v40, %v3186_v38 }
 0x210   :  { %v396_v46 = vsel %vm395_vm6, %v393_v44, %v3190_v43  ;;  %v397_v47 = vsel %vm395_vm6, %v394_v45, %v3191_v42 }
 0x211   :  { %v414_v48 = vpack.c.bf16 %v397_v47, %v396_v46  ;;  %v893_v46 = vld [vmem:[%s4156_s1 + $0x40] sm:$0x3f] }
 0x213   :  { %3012 = vmatmul.mubr.bf16.vlgmr.msra.gmra.mxu0 %v414_v48  ;;  %v970_v48 = vld [vmem:[%s4156_s1 + $0x80] sm:$0xff] }
 0x214   :  { %3060 = vmatprep.mubr.msk.f32.mxu0 %vm3409_vm3, %v3408_v16 }
 0x2d3   :  { %v498_v49 = vpop.f32.mrf.mxu0 }
 0x2d4   :  { %v499_v53 = vadd.f32 %v498_v49, %v415_v50 }
 0x2d5   :  { %v3013_v51 = vpop.f32.mrf.mxu0 }
 0x2d6   :  { %v972_v51 = vld [vmem:[%s4156_s1 + $0x90] sm:$0x3] }
 0x2d7   :  { %v501_v52 = vpop.f32.mrf.mxu0 }
 0x2d8   :  { %v502_v54 = vadd.f32 %v501_v52, %v415_v50  ;;  %v971_v50 = vld [vmem:[%s4156_s1 + $0x88] sm:$0xff]  ;;  %v973_v52 = vld [vmem:[%s4156_s1 + $0x98] sm:$0xff] }
 0x2d9   :  { %v3014_v55 = vpop.f32.mrf.mxu0 }
 0x2da   :  { %3366 = vtanh.f32 %v502_v54  ;;  %v975_v54 = vld [vmem:[%s4156_s1 + $0xa8] sm:$0x3]  ;;  %v3228_v55 = vld [vmem:[%s4157_s2 + $0x130] ss:$8 sps:$4 sm:$0xff]  }
 0x2db   :  { %3368 = vtanh.f32 %v499_v53  ;;  %v974_v53 = vld [vmem:[%s4156_s1 + $0xa0] sm:$0xff] }
 0x2e7   :  { %v3578_v56 = vpop.eup %3366 }
 0x2e8   :  { %3015 = vmatprep.subr.msk.mxu1 %vm33_vm0, %v3578_v56  ;;  %v3582_v57 = vpop.eup %3368 }
 0x2e9   :  { %3016 = vmatpush3.msk.msra.mxu1 %vm33_vm0, %v3578_v56 }
 0x2ea   :  { %3017 = vmatprep.subr.mxu1 %v3582_v57 }
 0x2eb   :  { %3018 = vmatpush3.msra.mxu1 %v3582_v57 }
 0x2ec   :  { %3020 = vmatmul.mubr.msk.f32.vlgmr.msra.gmra.mxu1 %vm118_vm2, %v3491_v11  ;;  %3022 = vmatprep.subr.msk.mxu1 %vm33_vm0, %v3578_v56 }
 0x2ed   :  { %3023 = vmatpush3.msk.msra.mxu1 %vm33_vm0, %v3578_v56  ;;  %3026 = vmatprep.mubr.msk.f32.mxu1 %vm118_vm2, %v3471_v8 }
 0x2ee   :  { %3024 = vmatprep.subr.mxu1 %v3582_v57 }
 0x2ef   :  { %3025 = vmatpush3.msra.mxu1 %v3582_v57 }
 0x2f0   :  { %3027 = vmatmul.mubr.msk.f32.vlgmr.msra.gmra.mxu1 %vm118_vm2, %v3496_v12  ;;  %3029 = vmatprep.subr.msk.mxu1 %vm33_vm0, %v3578_v56 }
 0x2f1   :  { %3030 = vmatpush3.msk.msra.mxu1 %vm33_vm0, %v3578_v56  ;;  %3033 = vmatprep.mubr.msk.f32.mxu1 %vm118_vm2, %v3503_v13 }
 0x2f2   :  { %3031 = vmatprep.subr.mxu1 %v3582_v57 }
 0x2f3   :  { %3032 = vmatpush3.msra.mxu1 %v3582_v57 }
 0x2f4   :  { %3034 = vmatmul.mubr.msk.f32.vlgmr.msra.gmra.mxu1 %vm118_vm2, %v3520_v14  ;;  %3036 = vmatprep.subr.bf16.mxu1 %v3408_v16 }
 0x2f5   :  { %3052 = vmatprep.mubr.msk.bf16.mxu1 %vm3409_vm3, %v3408_v16  ;;  %3037 = vmatpush3.bf16.msra.mxu1 %v3220_v58 }
 0x2f6   :  { %3038 = vmatprep.subr.bf16.mxu1 %v3408_v16 }
 0x2f9   :  { %3039 = vmatpush3.bf16.msra.mxu1 %v3221_v59 }
 0x2fa   :  { %3040 = vmatprep.subr.bf16.mxu1 %v3408_v16 }
 0x2fd   :  { %3041 = vmatpush3.bf16.msra.mxu1 %v3222_v60 }
 0x2fe   :  { %3042 = vmatprep.subr.bf16.mxu1 %v3408_v16 }
 0x301   :  { %3043 = vmatpush3.bf16.msra.mxu1 %v3223_v61 }
 0x302   :  { %3044 = vmatprep.subr.bf16.mxu1 %v3408_v16 }
 0x305   :  { %3045 = vmatpush3.bf16.msra.mxu1 %v3224_v62  ;;  %v3231_v62 = vld [vmem:[%s4157_s2 + $0x100] ss:$8 sps:$4 sm:$0xff]  }
 0x306   :  { %3046 = vmatprep.subr.bf16.mxu1 %v3408_v16 }
 0x309   :  { %3047 = vmatpush3.bf16.msra.mxu1 %v3225_v63 }
 0x30a   :  { %3048 = vmatprep.subr.bf16.mxu1 %v3408_v16 }
 0x30d   :  { %3049 = vmatpush3.bf16.msra.mxu1 %v3226_v0 }
 0x30e   :  { %3050 = vmatprep.subr.bf16.mxu1 %v3408_v16 }
 0x311   :  { %3051 = vmatpush3.bf16.msra.mxu1 %v3227_v2 }
 0x312   :  { %3115 = vmatprep.subr.mxu1 %v3408_v16 }
 0x3ac   :  { %v3021_v1 = vpop.f32.mrf.mxu1 }
 0x3ae   :  { %v576_v3 = vpop.f32.mrf.mxu1 }
 0x3af   :  { %v3192_v4 = vpack.i.bf16 %v3021_v1, %v576_v3 }
 0x3b0   :  { %v3028_v5 = vpop.f32.mrf.mxu1 }
 0x3b1   :  { %3193 = vrot.lane.b32.xlu1 %v3192_v4, %s3410_s30 }
 0x3b2   :  { %v651_v6 = vpop.f32.mrf.mxu1 }
 0x3b3   :  { %v3197_v7 = vpack.i.bf16 %v3028_v5, %v651_v6 }
 0x3b4   :  { %v3035_v8 = vpop.f32.mrf.mxu1 }
 0x3b5   :  { %3198 = vrot.lane.b32.xlu0 %v3197_v7, %s3411_s5 }
 0x3b6   :  { %v726_v11 = vpop.f32.mrf.mxu1 }
 0x3b7   :  { %v3202_v12 = vpack.i.bf16 %v3035_v8, %v726_v11 }
 0x3b9   :  { %877 = vrot.lane.b32.xlu0 %v3578_v56, %s3410_s30  ;;  %3203 = vrot.lane.b32.xlu1 %v3202_v12, %s3412_s0 }
 0x3bd   :  { %875 = vrot.lane.b32.xlu0 %v3582_v57, %s3410_s30 }
 0x423   :  { %v3194_v13 = vpop.permute.xlu1 %3193 }
 0x424   :  { %v3196_v15 = vunpack.i.h.bf16 %v3194_v13  ;;  %v3195_v17 = vunpack.i.l.bf16 %v3194_v13 }
 0x426   :  { %v760_v21 = vsel %vm389_vm4, %v3578_v56, %v3196_v15  ;;  %v759_v22 = vsel %vm389_vm4, %v3582_v57, %v3195_v17  ;;  %v3229_v56 = vld [vmem:[%s4157_s2 + $0x120] ss:$8 sps:$4 sm:$0xff]   ;;  %v3230_v57 = vld [vmem:[%s4157_s2 + $0x110] ss:$8 sps:$4 sm:$0xff]  }
 0x427   :  { %v3199_v14 = vpop.permute.xlu0 %3198 }
 0x428   :  { %v3201_v18 = vunpack.i.h.bf16 %v3199_v14  ;;  %v3200_v19 = vunpack.i.l.bf16 %v3199_v14 }
 0x42a   :  { %v762_v25 = vsel %vm392_vm5, %v760_v21, %v3201_v18  ;;  %v761_v26 = vsel %vm392_vm5, %v759_v22, %v3200_v19 }
 0x42b   :  { %v3204_v20 = vpop.permute.xlu1 %3203  ;;  %v878_v39 = vpop.permute.xlu0 %877 }
 0x42c   :  { %v3206_v23 = vunpack.i.h.bf16 %v3204_v20  ;;  %v3205_v24 = vunpack.i.l.bf16 %v3204_v20  ;;  %v890_v40 = vsel %vm389_vm4, %v3476_v9, %v878_v39  ;;  %v1186_v20 = vld [vmem:[%s4158_s3 + $0x2] ss:$0 sm:$0xff]  ;;  %v3234_v39 = vld [vmem:[%s4157_s2 + $0x190] ss:$8 sps:$4 sm:$0xff]  }
 0x42e   :  { %v764_v27 = vsel %vm395_vm6, %v762_v25, %v3206_v23  ;;  %v763_v28 = vsel %vm395_vm6, %v761_v26, %v3205_v24 }
 0x42f   :  { %v781_v29 = vpack.c.bf16 %v764_v27, %v763_v28  ;;  %v876_v42 = vpop.permute.xlu0 %875 }
 0x430   :  { %v889_v44 = vsel %vm389_vm4, %v3482_v10, %v876_v42  ;;  %v3237_v42 = vld [vmem:[%s4157_s2 + $0x160] ss:$8 sps:$4 sm:$0xff]  }
 0x431   :  { %3053 = vmatmul.mubr.bf16.vlgmr.msra.gmra.mxu1 %v781_v29 }
 0x432   :  { %3121 = vmatprep.mubr.msk.f32.mxu1 %vm3409_vm3, %v3408_v16 }
 0x4f1   :  { %v865_v30 = vpop.f32.mrf.mxu1 }
 0x4f2   :  { %v866_v36 = vadd.f32 %v865_v30, %v782_v32  ;;  %v1268_v30 = vld [vmem:[%s4156_s1 + $0x60] sm:$0xff] }
 0x4f3   :  { %v3054_v31 = vpop.f32.mrf.mxu1 }
 0x4f5   :  { %v868_v33 = vpop.f32.mrf.mxu1 }
 0x4f6   :  { %v869_v34 = vadd.f32 %v868_v33, %v782_v32  ;;  %v1270_v32 = vld [vmem:[%s4156_s1 + $0x70] sm:$0xff]  ;;  %v1269_v33 = vld [vmem:[%s4156_s1 + $0x68] sm:$0xff] }
 0x4f7   :  { %v3055_v35 = vpop.f32.mrf.mxu1 }
 0x4f8   :  { %3370 = vtanh.f32 %v869_v34  ;;  %v1271_v34 = vld [vmem:[%s4156_s1 + $0x78] sm:$0xff]  ;;  %v1690_v35 = vld [vmem:[%s4156_s1 + $0x48] sm:$0xff] }
 0x4f9   :  { %3372 = vtanh.f32 %v866_v36  ;;  %v1691_v36 = vld [vmem:[%s4156_s1 + $0x50] sm:$0xff] }
 0x505   :  { %v3371_v37 = vpop.eup %3370 }
 0x506   :  { %885 = vrot.lane.b32.xlu1 %v3371_v37, %s3411_s5  ;;  %v3373_v38 = vpop.eup %3372  ;;  %v3232_v37 = vld [vmem:[%s4157_s2 + $0x1b0] ss:$8 sps:$4 sm:$0xff]  }
 0x50a   :  { %883 = vrot.lane.b32.xlu1 %v3373_v38, %s3411_s5  ;;  %v3233_v38 = vld [vmem:[%s4157_s2 + $0x1a0] ss:$8 sps:$4 sm:$0xff]  }
 0x578   :  { %v886_v41 = vpop.permute.xlu1 %885 }
 0x579   :  { %v3670_v43 = vsel %vm392_vm5, %v890_v40, %v886_v41  ;;  %v3235_v40 = vld [vmem:[%s4157_s2 + $0x180] ss:$8 sps:$4 sm:$0xff]   ;;  %v3236_v41 = vld [vmem:[%s4157_s2 + $0x170] ss:$8 sps:$4 sm:$0xff]  }
 0x57a   :  { %3057 = vmatpush3.msk.msra.mxu0 %vm33_vm0, %v3670_v43 }
 0x57b   :  { %3058 = vmatprep.subr.mxu0 %v3408_v16 }
 0x57c   :  { %v884_v45 = vpop.permute.xlu1 %883 }
 0x57d   :  { %v3681_v9 = vsel %vm392_vm5, %v889_v44, %v884_v45  ;;  %v3239_v44 = vld [vmem:[%s4157_s2 + $0x140] ss:$8 sps:$4 sm:$0xff]  }
 0x57e   :  { %3059 = vmatpush3.msra.mxu0 %v3681_v9 }
 0x57f   :  { %3061 = vmatmul.mubr.msk.f32.vlgmr.msra.gmra.mxu0 %vm118_vm2, %v893_v46  ;;  %3063 = vmatprep.subr.mxu0 %v3408_v16 }
 0x580   :  { %3065 = vmatprep.mubr.msk.f32.mxu0 %vm3409_vm3, %v3408_v16 }
 0x63f   :  { %v3688_v47 = vpop.f32.mrf.mxu0 }
 0x640   :  { %977 = vrot.lane.b32.xlu0 %v3688_v47, %s3411_s5 }
 0x641   :  { %v3062_v10 = vpop.f32.mrf.mxu0 }
 0x642   :  { %v3242_v10 = vld [vmem:[%s4157_s2 + $0x234] ss:$8 sps:$4 sm:$0xff]  }
 0x6b2   :  { %v978_v49 = vpop.permute.xlu0 %977 }
 0x6b3   :  { %3064 = vmatpush3.msk.msra.mxu0 %vm989_vm7, %v978_v49 }
 0x6b4   :  { %3066 = vmatmul.mubr.msk.f32.vlgmr.msra.gmra.mxu0 %vm979_vm8, %v970_v48  ;;  %3074 = vmatprep.subr.mxu0 %v3408_v16 }
 0x6b5   :  { %3075 = vmatpush3.msk.msra.mxu0 %vm989_vm7, %v978_v49  ;;  %3068 = vmatprep.mubr.msk.f32.mxu0 %vm3409_vm3, %v3408_v16  ;;  %v3245_v49 = vld [vmem:[%s4157_s2 + $0x224] ss:$8 sps:$4 sm:$0xff]  }
 0x6b6   :  { %3085 = vmatprep.subr.bf16.mxu0 %v3228_v55 }
 0x6b8   :  { %3069 = vmatmul.mubr.msk.f32.gmra.mxu0 %vm979_vm8, %v971_v50 }
 0x6b9   :  { %3071 = vmatprep.mubr.msk.f32.mxu0 %vm3409_vm3, %v3408_v16 }
 0x6bc   :  { %3072 = vmatmul.mubr.msk.f32.gmra.mxu0 %vm979_vm8, %v972_v51  ;;  %v3243_v51 = vld [vmem:[%s4157_s2 + $0x220] ss:$8 sps:$4 sm:$0xff]  }
 0x6bd   :  { %3076 = vmatprep.mubr.msk.f32.mxu0 %vm3409_vm3, %v3408_v16 }
 0x6c0   :  { %3077 = vmatmul.mubr.msk.f32.vlgmr.msra.gmra.mxu0 %vm979_vm8, %v973_v52  ;;  %v3248_v52 = vld [vmem:[%s4157_s2 + $0x214] ss:$8 sps:$4 sm:$0xff]  }
 0x6c1   :  { %3079 = vmatprep.mubr.msk.f32.mxu0 %vm3409_vm3, %v3408_v16  ;;  %3086 = vmatpush3.bf16.msra.mxu0 %v3228_v55  ;;  %v3251_v55 = vld [vmem:[%s4157_s2 + $0x204] ss:$8 sps:$4 sm:$0xff]  }
 0x6c2   :  { %3087 = vmatprep.subr.bf16.mxu0 %v3229_v56 }
 0x6c4   :  { %3080 = vmatmul.mubr.msk.f32.gmra.mxu0 %vm979_vm8, %v974_v53 }
 0x6c5   :  { %3082 = vmatprep.mubr.msk.f32.mxu0 %vm3409_vm3, %v3408_v16  ;;  %3088 = vmatpush3.bf16.msra.mxu0 %v3229_v56 }
 0x6c6   :  { %3089 = vmatprep.subr.bf16.mxu0 %v3230_v57 }
 0x6c8   :  { %3083 = vmatmul.mubr.msk.f32.gmra.mxu0 %vm979_vm8, %v975_v54  ;;  %v3246_v54 = vld [vmem:[%s4157_s2 + $0x210] ss:$8 sps:$4 sm:$0xff]  }
 0x6c9   :  { %3090 = vmatpush3.bf16.msra.mxu0 %v3230_v57 }
 0x6ca   :  { %3091 = vmatprep.subr.bf16.mxu0 %v3231_v62 }
 0x6cd   :  { %3092 = vmatpush3.bf16.msra.mxu0 %v3231_v62  ;;  %v3252_v62 = vld [vmem:[%s4157_s2 + $0x1f0] ss:$8 sps:$4 sm:$0xff]  }
 0x6ce   :  { %3097 = vmatprep.subr.mxu0 %v3408_v16 }
 0x774   :  { %v1058_v58 = vpop.f32.mrf.mxu0 }
 0x776   :  { %v3067_v59 = vpop.f32.mrf.mxu0 }
 0x777   :  { %v3254_v59 = vld [vmem:[%s4157_s2 + $0x1f4] ss:$8 sps:$4 sm:$0xff]  }
 0x778   :  { %v1063_v60 = vpop.f32.mrf.mxu0 }
 0x77a   :  { %v3070_v61 = vpop.f32.mrf.mxu0 }
 0x77c   :  { %v1068_v63 = vpop.f32.mrf.mxu0 }
 0x77e   :  { %v3073_v0 = vpop.f32.mrf.mxu0 }
 0x780   :  { %v1147_v1 = vpop.f32.mrf.mxu0 }
 0x782   :  { %v3078_v2 = vpop.f32.mrf.mxu0 }
 0x783   :  { %v3255_v2 = vld [vmem:[%s4157_s2 + $0x1e0] ss:$8 sps:$4 sm:$0xff]  }
 0x784   :  { %v1152_v3 = vpop.f32.mrf.mxu0 }
 0x785   :  { %v3207_v4 = vpack.i.bf16 %v1152_v3, %v1147_v1 }
 0x786   :  { %v3081_v5 = vpop.f32.mrf.mxu0 }
 0x787   :  { %3208 = vrot.lane.b32.xlu1 %v3207_v4, %s3410_s30  ;;  %v3260_v5 = vld [vmem:[%s4157_s2 + $0x1d4] ss:$8 sps:$4 sm:$0xff]  }
 0x788   :  { %v1157_v6 = vpop.f32.mrf.mxu0 }
 0x789   :  { %1168 = vrot.lane.b32.xlu0 %v1157_v6, %s3410_s30 }
 0x78a   :  { %v3084_v7 = vpop.f32.mrf.mxu0 }
 0x78b   :  { %v3258_v7 = vld [vmem:[%s4157_s2 + $0x1d0] ss:$8 sps:$4 sm:$0xff]  }
 0x7f9   :  { %v3209_v8 = vpop.permute.xlu1 %3208 }
 0x7fa   :  { %v3211_v11 = vunpack.i.h.bf16 %v3209_v8  ;;  %v3210_v12 = vunpack.i.l.bf16 %v3209_v8  ;;  %v3263_v8 = vld [vmem:[%s4157_s2 + $0x1c4] ss:$8 sps:$4 sm:$0xff]  }
 0x7fb   :  { %v1169_v13 = vpop.permute.xlu0 %1168 }
 0x7fc   :  { %v1174_v14 = vsel %vm389_vm4, %v1063_v60, %v3211_v11  ;;  %v1173_v15 = vsel %vm389_vm4, %v1058_v58, %v3210_v12  ;;  %v1175_v17 = vsel %vm389_vm4, %v1068_v63, %v1169_v13  ;;  %v3249_v58 = vld [vmem:[%s4157_s2 + $0x200] ss:$8 sps:$4 sm:$0xff]   ;;  %v3257_v63 = vld [vmem:[%s4157_s2 + $0x1e4] ss:$8 sps:$4 sm:$0xff]   ;;  %v3266_v12 = vld [vmem:[%s4157_s2 + $0x2b4] ss:$8 sps:$4 sm:$0xff]  }
 0x7fd   :  { %v1184_v18 = vpack.c.bf16 %v1174_v14, %v1173_v15  ;;  %v1185_v19 = vpack.c.bf16 %v1175_v17, %v1175_v17  ;;  %v3261_v11 = vld [vmem:[%s4157_s2 + $0x1c0] ss:$8 sps:$4 sm:$0xff]   ;;  %v3264_v13 = vld [vmem:[%s4157_s2 + $0x2b0] ss:$8 sps:$4 sm:$0xff]   ;;  %v3269_v14 = vld [vmem:[%s4157_s2 + $0x2a4] ss:$8 sps:$4 sm:$0xff]  }
 0x7fe   :  { %v3267_v15 = vld [vmem:[%s4157_s2 + $0x2a0] ss:$8 sps:$4 sm:$0xff]   ;;  %v3272_v17 = vld [vmem:[%s4157_s2 + $0x294] ss:$8 sps:$4 sm:$0xff]  }
 0x7ff   :  { %3093 = vmatprep.mubr.msk.bf16.mxu0 %vm392_vm5, %v1184_v18  ;;  %v3270_v18 = vld [vmem:[%s4157_s2 + $0x290] ss:$8 sps:$4 sm:$0xff]  }
 0x800   :  { %3094 = vmatmul.mubr.msk.bf16.vlgmr.msra.gmra.mxu0 %vm392_vm5, %v1185_v19  ;;  %v3275_v19 = vld [vmem:[%s4157_s2 + $0x284] ss:$8 sps:$4 sm:$0xff]  }
 0x801   :  { %3103 = vmatprep.mubr.msk.f32.mxu0 %vm3409_vm3, %v3408_v16 }
 0x8c0   :  { %v3095_v21 = vpop.f32.mrf.mxu0 }
 0x8c1   :  { %v1260_v22 = vadd.f32 %v3095_v21, %v1186_v20  ;;  %v3278_v21 = vld [vmem:[%s4157_s2 + $0x274] ss:$8 sps:$4 sm:$0xff]  }
 0x8c2   :  { %v1251_v23 = vpop.f32.mrf.mxu0 }
 0x8c3   :  { %3374 = vtanh.f32 %v1260_v22  ;;  %v1252_v26 = vadd.f32 %v1251_v23, %v1186_v20  ;;  %v3276_v22 = vld [vmem:[%s4157_s2 + $0x270] ss:$8 sps:$4 sm:$0xff]   ;;  %v3281_v23 = vld [vmem:[%s4157_s2 + $0x264] ss:$8 sps:$4 sm:$0xff]  }
 0x8c4   :  { %v3096_v24 = vpop.f32.mrf.mxu0 }
 0x8c5   :  { %v3279_v24 = vld [vmem:[%s4157_s2 + $0x260] ss:$8 sps:$4 sm:$0xff]  }
 0x8c6   :  { %v1254_v25 = vpop.f32.mrf.mxu0 }
 0x8c7   :  { %v1255_v27 = vadd.f32 %v1254_v25, %v1186_v20  ;;  %v3273_v20 = vld [vmem:[%s4157_s2 + $0x280] ss:$8 sps:$4 sm:$0xff]   ;;  %v3284_v25 = vld [vmem:[%s4157_s2 + $0x254] ss:$8 sps:$4 sm:$0xff]  }
 0x8c9   :  { %3376 = vtanh.f32 %v1255_v27  ;;  %v3287_v27 = vld [vmem:[%s4157_s2 + $0x244] ss:$8 sps:$4 sm:$0xff]  }
 0x8ca   :  { %3378 = vtanh.f32 %v1252_v26  ;;  %v3282_v26 = vld [vmem:[%s4157_s2 + $0x250] ss:$8 sps:$4 sm:$0xff]  }
 0x8d0   :  { %v3375_v28 = vpop.eup %3374 }
 0x8d1   :  { %3098 = vmatpush3.msk.msra.mxu0 %vm33_vm0, %v3375_v28  ;;  %3116 = vmatpush3.msk.msra.mxu1 %vm33_vm0, %v3375_v28 }
 0x8d2   :  { %3099 = vmatprep.subr.mxu0 %v3408_v16  ;;  %3117 = vmatprep.subr.mxu1 %v3408_v16 }
 0x8d6   :  { %v3377_v29 = vpop.eup %3376 }
 0x8d7   :  { %3100 = vmatpush3.msra.mxu0 %v3377_v29  ;;  %3118 = vmatpush3.msra.mxu1 %v3377_v29  ;;  %v3379_v31 = vpop.eup %3378 }
 0x8d8   :  { %3101 = vmatprep.subr.mxu0 %v3408_v16  ;;  %3119 = vmatprep.subr.mxu1 %v3408_v16 }
 0x8d9   :  { %3102 = vmatpush3.msra.mxu0 %v3379_v31  ;;  %3120 = vmatpush3.msra.mxu1 %v3379_v31 }
 0x8da   :  { %3106 = vmatprep.subr.mxu0 %v3408_v16  ;;  %3104 = vmatmul.mubr.msk.f32.vlgmr.msra.gmra.mxu0 %vm1272_vm9, %v1268_v30 }
 0x8db   :  { %3107 = vmatpush3.msk.msra.mxu0 %vm33_vm0, %v3375_v28  ;;  %3112 = vmatprep.mubr.msk.f32.mxu0 %vm3409_vm3, %v3408_v16 }
 0x8dc   :  { %3108 = vmatprep.subr.mxu0 %v3408_v16  ;;  %3122 = vmatmul.mubr.msk.f32.vlgmr.msra.gmra.mxu1 %vm1272_vm9, %v1270_v32 }
 0x8dd   :  { %3109 = vmatpush3.msra.mxu0 %v3377_v29  ;;  %3133 = vmatprep.subr.bf16.mxu1 %v3408_v16 }
 0x8de   :  { %3110 = vmatprep.subr.mxu0 %v3408_v16  ;;  %3149 = vmatprep.mubr.msk.bf16.mxu1 %vm3409_vm3, %v3408_v16 }
 0x8df   :  { %3111 = vmatpush3.msra.mxu0 %v3379_v31  ;;  %3134 = vmatpush3.bf16.msra.mxu1 %v3232_v37 }
 0x8e0   :  { %3113 = vmatmul.mubr.msk.f32.vlgmr.msra.gmra.mxu0 %vm1272_vm9, %v1269_v33  ;;  %3124 = vmatprep.subr.mxu0 %v3408_v16 }
 0x8e1   :  { %3125 = vmatpush3.msk.msra.mxu0 %vm33_vm0, %v3375_v28  ;;  %3130 = vmatprep.mubr.msk.f32.mxu0 %vm3409_vm3, %v3408_v16  ;;  %v3285_v28 = vld [vmem:[%s4157_s2 + $0x240] ss:$8 sps:$4 sm:$0xff]  }
 0x8e2   :  { %3126 = vmatprep.subr.mxu0 %v3408_v16  ;;  %3135 = vmatprep.subr.bf16.mxu1 %v3408_v16 }
 0x8e3   :  { %3127 = vmatpush3.msra.mxu0 %v3377_v29  ;;  %3136 = vmatpush3.bf16.msra.mxu1 %v3233_v38 }
 0x8e4   :  { %3128 = vmatprep.subr.mxu0 %v3408_v16  ;;  %3137 = vmatprep.subr.bf16.mxu1 %v3408_v16 }
 0x8e5   :  { %3129 = vmatpush3.msra.mxu0 %v3379_v31 }
 0x8e6   :  { %3131 = vmatmul.mubr.msk.f32.vlgmr.msra.gmra.mxu0 %vm1272_vm9, %v1271_v34  ;;  %3153 = vmatprep.subr.mxu0 %v3408_v16 }
 0x8e7   :  { %3154 = vmatpush3.msk.msra.mxu0 %vm989_vm7, %v3688_v47  ;;  %3155 = vmatprep.mubr.msk.f32.mxu0 %vm3409_vm3, %v3408_v16 }
 0x8e8   :  { %3158 = vmatprep.subr.mxu0 %v3408_v16  ;;  %3138 = vmatpush3.bf16.msra.mxu1 %v3234_v39 }
 0x8e9   :  { %3139 = vmatprep.subr.bf16.mxu1 %v3408_v16 }
 0x8ea   :  { %3156 = vmatmul.mubr.msk.f32.vlgmr.msra.gmra.mxu0 %vm979_vm8, %v1690_v35 }
 0x8eb   :  { %3159 = vmatpush3.msk.msra.mxu0 %vm989_vm7, %v3688_v47  ;;  %3160 = vmatprep.mubr.msk.f32.mxu0 %vm3409_vm3, %v3408_v16  ;;  %v3240_v47 = vld [vmem:[%s4157_s2 + $0x230] ss:$8 sps:$4 sm:$0xff]  }
 0x8ec   :  { %3163 = vmatprep.subr.mxu0 %v3408_v16  ;;  %3140 = vmatpush3.bf16.msra.mxu1 %v3235_v40 }
 0x8ed   :  { %3141 = vmatprep.subr.bf16.mxu1 %v3408_v16 }
 0x8ee   :  { %3161 = vmatmul.mubr.msk.f32.vlgmr.msra.gmra.mxu0 %vm979_vm8, %v1691_v36 }
 0x8ef   :  { %3164 = vmatpush3.msk.msra.mxu0 %vm33_vm0, %v3670_v43  ;;  %3167 = vmatprep.mubr.msk.f32.mxu0 %vm3409_vm3, %v3408_v16  ;;  %v3238_v43 = vld [vmem:[%s4157_s2 + $0x150] ss:$8 sps:$4 sm:$0xff]  }
 0x8f0   :  { %3165 = vmatprep.subr.mxu0 %v3408_v16  ;;  %3142 = vmatpush3.bf16.msra.mxu1 %v3236_v41 }
 0x8f1   :  { %3166 = vmatpush3.msra.mxu0 %v3681_v9  ;;  %3143 = vmatprep.subr.bf16.mxu1 %v3408_v16 }
 0x8f2   :  { %2414 = vmatprep.subr.bf16.mxu0 %v3242_v10  ;;  %v3320_v10 = vld [vmem:[%s4157_s2 + $0x414] ss:$8 sps:$4 sm:$0xff]  }
 0x8f4   :  { %3144 = vmatpush3.bf16.msra.mxu1 %v3237_v42  ;;  %v3288_v42 = vld [vmem:[%s4157_s2 + $0x330] ss:$8 sps:$4 sm:$0xff]  }
 0x8f5   :  { %3145 = vmatprep.subr.bf16.mxu1 %v3408_v16 }
 0x8f8   :  { %3146 = vmatpush3.bf16.msra.mxu1 %v3238_v43  ;;  %v3290_v43 = vld [vmem:[%s4157_s2 + $0x334] ss:$8 sps:$4 sm:$0xff]  }
 0x8f9   :  { %3147 = vmatprep.subr.bf16.mxu1 %v3408_v16  ;;  %v1692_v16 = vld [vmem:[%s4156_s1 + $0x58] sm:$0xff] }
 0x8fa   :  { %3168 = vmatmul.mubr.msk.f32.vlgmr.msra.gmra.mxu0 %vm118_vm2, %v1692_v16  ;;  %v3299_v16 = vld [vmem:[%s4157_s2 + $0x304] ss:$8 sps:$4 sm:$0xff]  }
 0x8fb   :  { %2415 = vmatpush1.bf16.msra.mxu0 %v3240_v47  ;;  %v3294_v47 = vld [vmem:[%s4157_s2 + $0x310] ss:$8 sps:$4 sm:$0xff]  }
 0x8fc   :  { %3148 = vmatpush3.bf16.msra.mxu1 %v3239_v44  ;;  %2416 = vmatprep.subr.bf16.mxu0 %v3245_v49  ;;  %v3293_v44 = vld [vmem:[%s4157_s2 + $0x324] ss:$8 sps:$4 sm:$0xff]   ;;  %v3324_v49 = vld [vmem:[%s4157_s2 + $0x400] ss:$8 sps:$4 sm:$0xff]  }
 0x8fd   :  { %2455 = vmatprep.subr.bf16.mxu1 %v3290_v43  ;;  %v3354_v43 = vld [vmem:[%s4157_s2 + $0x490] ss:$8 sps:$4 sm:$0xff]  }
 0x8ff   :  { %2417 = vmatpush1.bf16.msra.mxu0 %v3243_v51  ;;  %v3332_v51 = vld [vmem:[%s4157_s2 + $0x3f4] ss:$8 sps:$4 sm:$0xff]  }
 0x900   :  { %2418 = vmatprep.subr.bf16.mxu0 %v3248_v52  ;;  %v3302_v52 = vld [vmem:[%s4157_s2 + $0x2f4] ss:$8 sps:$4 sm:$0xff]  }
 0x903   :  { %2419 = vmatpush1.bf16.msra.mxu0 %v3246_v54  ;;  %v3300_v54 = vld [vmem:[%s4157_s2 + $0x2f0] ss:$8 sps:$4 sm:$0xff]  }
 0x904   :  { %2420 = vmatprep.subr.bf16.mxu0 %v3251_v55  ;;  %v3338_v55 = vld [vmem:[%s4157_s2 + $0x3e4] ss:$8 sps:$4 sm:$0xff]  }
 0x907   :  { %2421 = vmatpush1.bf16.msra.mxu0 %v3249_v58  ;;  %v3303_v58 = vld [vmem:[%s4157_s2 + $0x2e0] ss:$8 sps:$4 sm:$0xff]  }
 0x908   :  { %2422 = vmatprep.subr.bf16.mxu0 %v3254_v59  ;;  %v3344_v59 = vld [vmem:[%s4157_s2 + $0x3d4] ss:$8 sps:$4 sm:$0xff]  }
 0x90b   :  { %2423 = vmatpush1.bf16.msra.mxu0 %v3252_v62  ;;  %v3306_v62 = vld [vmem:[%s4157_s2 + $0x2d0] ss:$8 sps:$4 sm:$0xff]  }
 0x90c   :  { %2424 = vmatprep.subr.bf16.mxu0 %v3257_v63  ;;  %v3350_v63 = vld [vmem:[%s4157_s2 + $0x3c4] ss:$8 sps:$4 sm:$0xff]  }
 0x90f   :  { %2425 = vmatpush1.bf16.msra.mxu0 %v3255_v2  ;;  %v3309_v2 = vld [vmem:[%s4157_s2 + $0x2c0] ss:$8 sps:$4 sm:$0xff]  }
 0x910   :  { %2426 = vmatprep.subr.bf16.mxu0 %v3260_v5  ;;  %v3317_v5 = vld [vmem:[%s4157_s2 + $0x3a4] ss:$8 sps:$4 sm:$0xff]  }
 0x913   :  { %2427 = vmatpush1.bf16.msra.mxu0 %v3258_v7  ;;  %v3323_v7 = vld [vmem:[%s4157_s2 + $0x394] ss:$8 sps:$4 sm:$0xff]  }
 0x914   :  { %2428 = vmatprep.subr.bf16.mxu0 %v3263_v8  ;;  %v3321_v8 = vld [vmem:[%s4157_s2 + $0x390] ss:$8 sps:$4 sm:$0xff]  }
 0x917   :  { %2429 = vmatpush1.bf16.msra.mxu0 %v3261_v11  ;;  %v3329_v11 = vld [vmem:[%s4157_s2 + $0x384] ss:$8 sps:$4 sm:$0xff]  }
 0x918   :  { %2430 = vmatprep.subr.bf16.mxu0 %v3266_v12  ;;  %v3327_v12 = vld [vmem:[%s4157_s2 + $0x380] ss:$8 sps:$4 sm:$0xff]  }
 0x91b   :  { %2431 = vmatpush2.bf16.msra.mxu0 %v3264_v13  ;;  %v3335_v13 = vld [vmem:[%s4157_s2 + $0x374] ss:$8 sps:$4 sm:$0xff]  }
 0x91c   :  { %2432 = vmatprep.subr.bf16.mxu0 %v3269_v14  ;;  %v3333_v14 = vld [vmem:[%s4157_s2 + $0x370] ss:$8 sps:$4 sm:$0xff]  }
 0x91f   :  { %2433 = vmatpush2.bf16.msra.mxu0 %v3267_v15  ;;  %v3341_v15 = vld [vmem:[%s4157_s2 + $0x364] ss:$8 sps:$4 sm:$0xff]  }
 0x920   :  { %2434 = vmatprep.subr.bf16.mxu0 %v3272_v17  ;;  %v3339_v17 = vld [vmem:[%s4157_s2 + $0x360] ss:$8 sps:$4 sm:$0xff]  }
 0x923   :  { %2435 = vmatpush2.bf16.msra.mxu0 %v3270_v18  ;;  %v3347_v18 = vld [vmem:[%s4157_s2 + $0x354] ss:$8 sps:$4 sm:$0xff]  }
 0x924   :  { %2436 = vmatprep.subr.bf16.mxu0 %v3275_v19  ;;  %v3345_v19 = vld [vmem:[%s4157_s2 + $0x350] ss:$8 sps:$4 sm:$0xff]  }
 0x927   :  { %2437 = vmatpush2.bf16.msra.mxu0 %v3273_v20  ;;  %v1600_v20 = vld [vmem:[%s4158_s3 + $0x3] ss:$0 sm:$0xff] }
 0x928   :  { %2438 = vmatprep.subr.bf16.mxu0 %v3278_v21 }
 0x92b   :  { %2439 = vmatpush2.bf16.msra.mxu0 %v3276_v22 }
 0x92c   :  { %2440 = vmatprep.subr.bf16.mxu0 %v3281_v23 }
 0x92f   :  { %2441 = vmatpush2.bf16.msra.mxu0 %v3279_v24 }
 0x930   :  { %2442 = vmatprep.subr.bf16.mxu0 %v3284_v25  ;;  %v3353_v25 = vld [vmem:[%s4157_s2 + $0x344] ss:$8 sps:$4 sm:$0xff]  }
 0x933   :  { %2443 = vmatpush2.bf16.msra.mxu0 %v3282_v26 }
 0x934   :  { %2444 = vmatprep.subr.bf16.mxu0 %v3287_v27  ;;  %v3351_v27 = vld [vmem:[%s4157_s2 + $0x340] ss:$8 sps:$4 sm:$0xff]  }
 0x937   :  { %2445 = vmatpush2.bf16.msra.mxu0 %v3285_v28 }
 0x938   :  { %2500 = vmatprep.subr.bf16.mxu0 %v3320_v10  ;;  %v3360_v10 = vld [vmem:[%s4157_s2 + $0x430] ss:$8 sps:$4 sm:$0xff]  }
 0x99a   :  { %v3847_v45 = vpop.f32.mrf.mxu0 }
 0x99c   :  { %v3105_v46 = vpop.f32.mrf.mxu0  ;;  %v1491_v9 = vpop.f32.mrf.mxu1 }
 0x99d   :  { %1573 = vrot.lane.b32.xlu0 %v1491_v9, %s3411_s5  ;;  %v3296_v46 = vld [vmem:[%s4157_s2 + $0x314] ss:$8 sps:$4 sm:$0xff]   ;;  %v3318_v9 = vld [vmem:[%s4157_s2 + $0x410] ss:$8 sps:$4 sm:$0xff]  }
 0x99e   :  { %v3123_v48 = vpop.f32.mrf.mxu1 }
 0x99f   :  { %v3326_v48 = vld [vmem:[%s4157_s2 + $0x404] ss:$8 sps:$4 sm:$0xff]  }
 0x9a0   :  { %v1418_v50 = vpop.f32.mrf.mxu0 }
 0x9a1   :  { %1569 = vrot.lane.b32.xlu1 %v1418_v50, %s3410_s30  ;;  %v3297_v50 = vld [vmem:[%s4157_s2 + $0x300] ss:$8 sps:$4 sm:$0xff]  }
 0x9a2   :  { %v3114_v53 = vpop.f32.mrf.mxu0 }
 0x9a3   :  { %v3330_v53 = vld [vmem:[%s4157_s2 + $0x3f0] ss:$8 sps:$4 sm:$0xff]  }
 0x9a6   :  { %v1564_v56 = vpop.f32.mrf.mxu0 }
 0x9a7   :  { %1577 = vrot.lane.b32.xlu1 %v1564_v56, %s3412_s0  ;;  %v3305_v56 = vld [vmem:[%s4157_s2 + $0x2e4] ss:$8 sps:$4 sm:$0xff]  }
 0x9a8   :  { %v3132_v57 = vpop.f32.mrf.mxu0 }
 0x9a9   :  { %v3336_v57 = vld [vmem:[%s4157_s2 + $0x3e0] ss:$8 sps:$4 sm:$0xff]  }
 0x9aa   :  { %v3883_v60 = vpop.f32.mrf.mxu0 }
 0x9ac   :  { %v3157_v61 = vpop.f32.mrf.mxu0 }
 0x9ad   :  { %v3342_v61 = vld [vmem:[%s4157_s2 + $0x3d0] ss:$8 sps:$4 sm:$0xff]  }
 0x9ae   :  { %v1837_v0 = vpop.f32.mrf.mxu0 }
 0x9af   :  { %v1914_v1 = vsub.f32 %v3883_v60, %v1837_v0  ;;  %1918 = vrot.lane.b32.xlu0 %v1837_v0, %s3412_s0  ;;  %v1916_v6 = vmul.f32 %v1837_v0, %v3883_v60  ;;  %v3311_v0 = vld [vmem:[%s4157_s2 + $0x2c4] ss:$8 sps:$4 sm:$0xff]  }
 0x9b0   :  { %v3162_v3 = vpop.f32.mrf.mxu0 }
 0x9b1   :  { %v1915_v4 = vand.u32 2147483647, %v1914_v1  ;;  %v3348_v1 = vld [vmem:[%s4157_s2 + $0x3c0] ss:$8 sps:$4 sm:$0xff]   ;;  %v3314_v3 = vld [vmem:[%s4157_s2 + $0x3b4] ss:$8 sps:$4 sm:$0xff]  }
 0x9b3   :  { %1922 = vrot.lane.b32.xlu1 %v1915_v4, %s3411_s5  ;;  %v3312_v4 = vld [vmem:[%s4157_s2 + $0x3b0] ss:$8 sps:$4 sm:$0xff]  }
 0x9b7   :  { %1926 = vrot.lane.b32.xlu1 %v1916_v6, %s3410_s30  ;;  %v3315_v6 = vld [vmem:[%s4157_s2 + $0x3a0] ss:$8 sps:$4 sm:$0xff]  }
 0x9ba   :  { %v1910_v24 = vpop.f32.mrf.mxu0 }
 0x9bc   :  { %v3169_v28 = vpop.f32.mrf.mxu0 }
 0xa0f   :  { %v1574_v31 = vpop.permute.xlu0 %1573 }
 0xa13   :  { %v1570_v29 = vpop.permute.xlu1 %1569 }
 0xa14   :  { %v1580_v30 = vsel %vm389_vm4, %v3847_v45, %v1570_v29  ;;  %v3291_v45 = vld [vmem:[%s4157_s2 + $0x320] ss:$8 sps:$4 sm:$0xff]  }
 0xa15   :  { %v1581_v32 = vsel %vm392_vm5, %v1580_v30, %v1574_v31  ;;  %v3413_v30 = vmov 0  }
 0xa19   :  { %v1578_v33 = vpop.permute.xlu1 %1577 }
 0xa1a   :  { %v1582_v34 = vsel %vm395_vm6, %v1581_v32, %v1578_v33 }
 0xa1b   :  { %v1599_v35 = vpack.c.bf16 %v1582_v34, %v1582_v34 }
 0xa1d   :  { %3150 = vmatmul.mubr.bf16.vlgmr.msra.gmra.mxu1 %v1599_v35 }
 0xa1e   :  { %2456 = vmatpush1.bf16.msra.mxu1 %v3288_v42 }
 0xa1f   :  { %2457 = vmatprep.subr.bf16.mxu1 %v3293_v44 }
 0xa21   :  { %v1919_v36 = vpop.permute.xlu0 %1918 }
 0xa22   :  { %v1933_v37 = vsel %vm395_vm6, %v3883_v60, %v1919_v36  ;;  %2458 = vmatpush1.bf16.msra.mxu1 %v3291_v45  ;;  %v3308_v60 = vld [vmem:[%s4157_s2 + $0x2d4] ss:$8 sps:$4 sm:$0xff]   ;;  %v3355_v45 = vld [vmem:[%s4157_s2 + $0x480] ss:$8 sps:$4 sm:$0xff]  }
 0xa23   :  { %v2013_v39 = vpack.c.bf16 %v1933_v37, %v1933_v37  ;;  %2459 = vmatprep.subr.bf16.mxu1 %v3296_v46  ;;  %v3357_v46 = vld [vmem:[%s4157_s2 + $0x460] ss:$8 sps:$4 sm:$0xff]  }
 0xa25   :  { %v3965_v38 = vpop.permute.xlu1 %1922 }
 0xa26   :  { %v1934_v40 = vsel %vm392_vm5, %v1919_v36, %v3965_v38  ;;  %2460 = vmatpush1.bf16.msra.mxu1 %v3294_v47  ;;  %v3359_v47 = vld [vmem:[%s4157_s2 + $0x440] ss:$8 sps:$4 sm:$0xff]  }
 0xa27   :  { %v2014_v41 = vpack.c.bf16 %v1934_v40, %v1934_v40  ;;  %2461 = vmatprep.subr.bf16.mxu1 %v3299_v16  ;;  %v3361_v16 = vld [vmem:[%s4157_s2 + $0x420] ss:$8 sps:$4 sm:$0xff]  }
 0xa29   :  { %2446 = vmatprep.mubr.bf16.mxu0 %v2014_v41  ;;  %v1927_v36 = vpop.permute.xlu1 %1926 }
 0xa2a   :  { %2447 = vmatmul.mubr.bf16.vlgmr.msra.gmra.mxu0 %v2013_v39  ;;  %2462 = vmatpush1.bf16.msra.mxu1 %v3297_v50  ;;  %v1935_v37 = vsel %vm389_vm4, %v3965_v38, %v1927_v36  ;;  %v3356_v38 = vld [vmem:[%s4157_s2 + $0x470] ss:$8 sps:$4 sm:$0xff]  }
 0xa2b   :  { %2501 = vmatpush1.bf16.msra.mxu0 %v3318_v9  ;;  %2463 = vmatprep.subr.bf16.mxu1 %v3302_v52  ;;  %v2015_v44 = vpack.c.bf16 %v1935_v37, %v1935_v37  ;;  %v3358_v9 = vld [vmem:[%s4157_s2 + $0x450] ss:$8 sps:$4 sm:$0xff]   ;;  %v2021_v52 = vlaneseq }
 0xa2c   :  { %2502 = vmatprep.subr.bf16.mxu0 %v3326_v48  ;;  %2528 = vmatprep.mubr.bf16.mxu0 %v3413_v30  ;;  %v3362_v48 = vld [vmem:[%s4157_s2 + $0x4d0] ss:$8 sps:$4 sm:$0xff]  }
 0xa2d   :  { %v3364_v50 = vld [vmem:[%s4157_s2 + $0x4b0] ss:$8 sps:$4 sm:$0xff]  }
 0xa2e   :  { %2464 = vmatpush1.bf16.msra.mxu1 %v3300_v54 }
 0xa2f   :  { %2503 = vmatpush1.bf16.msra.mxu0 %v3324_v49  ;;  %2465 = vmatprep.subr.bf16.mxu1 %v3305_v56  ;;  %v3363_v49 = vld [vmem:[%s4157_s2 + $0x4c0] ss:$8 sps:$4 sm:$0xff]  }
 0xa30   :  { %2504 = vmatprep.subr.bf16.mxu0 %v3332_v51  ;;  %v3365_v51 = vld [vmem:[%s4157_s2 + $0x4a0] ss:$8 sps:$4 sm:$0xff]  }
 0xa32   :  { %2466 = vmatpush1.bf16.msra.mxu1 %v3303_v58 }
 0xa33   :  { %2505 = vmatpush1.bf16.msra.mxu0 %v3330_v53  ;;  %2467 = vmatprep.subr.bf16.mxu1 %v3308_v60  ;;  %v2022_v53 = vshrl.u32 %v2021_v52, 7 }
 0xa34   :  { %2506 = vmatprep.subr.bf16.mxu0 %v3338_v55  ;;  %v2772_v55 = vld [vmem:[%s4158_s3 + $0x4] ss:$8 sm:$0x3] }
 0xa35   :  { %v2023_v54 = vsub.s32 0, %v2022_v53  ;;  %v2027_v56 = vsub.s32 1, %v2022_v53 }
 0xa36   :  { %2468 = vmatpush1.bf16.msra.mxu1 %v3306_v62 }
 0xa37   :  { %2507 = vmatpush1.bf16.msra.mxu0 %v3336_v57  ;;  %2469 = vmatprep.subr.bf16.mxu1 %v3311_v0  ;;  %v2024_v57 = vrot.slane %v2772_v55, %v2023_v54  ;;  %v2028_v58 = vrot.slane %v2772_v55, %v2027_v56 }
 0xa38   :  { %2508 = vmatprep.subr.bf16.mxu0 %v3344_v59 }
 0xa3a   :  { %2470 = vmatpush1.bf16.msra.mxu1 %v3309_v2 }
 0xa3b   :  { %2509 = vmatpush1.bf16.msra.mxu0 %v3342_v61  ;;  %2471 = vmatprep.subr.bf16.mxu1 %v3314_v3 }
 0xa3c   :  { %2510 = vmatprep.subr.bf16.mxu0 %v3350_v63 }
 0xa3e   :  { %2472 = vmatpush2.bf16.msra.mxu1 %v3312_v4 }
 0xa3f   :  { %2511 = vmatpush1.bf16.msra.mxu0 %v3348_v1  ;;  %2473 = vmatprep.subr.bf16.mxu1 %v3317_v5 }
 0xa42   :  { %2474 = vmatpush2.bf16.msra.mxu1 %v3315_v6 }
 0xa43   :  { %2475 = vmatprep.subr.bf16.mxu1 %v3323_v7 }
 0xa46   :  { %2476 = vmatpush2.bf16.msra.mxu1 %v3321_v8 }
 0xa47   :  { %2477 = vmatprep.subr.bf16.mxu1 %v3329_v11 }
 0xa4a   :  { %2478 = vmatpush2.bf16.msra.mxu1 %v3327_v12 }
 0xa4b   :  { %2479 = vmatprep.subr.bf16.mxu1 %v3335_v13 }
 0xa4e   :  { %2480 = vmatpush2.bf16.msra.mxu1 %v3333_v14 }
 0xa4f   :  { %2481 = vmatprep.subr.bf16.mxu1 %v3341_v15  ;;  %v2565_v15 = vld [vmem:[%s4158_s3 + $0x5] ss:$0 sm:$0xff] }
 0xa52   :  { %2482 = vmatpush2.bf16.msra.mxu1 %v3339_v17 }
 0xa53   :  { %2483 = vmatprep.subr.bf16.mxu1 %v3347_v18 }
 0xa56   :  { %2484 = vmatpush2.bf16.msra.mxu1 %v3345_v19 }
 0xa57   :  { %2485 = vmatprep.subr.bf16.mxu1 %v3353_v25 }
 0xa5a   :  { %2486 = vmatpush2.bf16.msra.mxu1 %v3351_v27 }
 0xa5b   :  { %2641 = vmatprep.subr.bf16.mxu1 %v3413_v30 }
 0xadd   :  { %v1683_v21 = vpop.f32.mrf.mxu1 }
 0xade   :  { %v1684_v22 = vadd.f32 %v1683_v21, %v1600_v20 }
 0xadf   :  { %v3151_v23 = vpop.f32.mrf.mxu1 }
 0xae0   :  { %3380 = vtanh.f32 %v1684_v22 }
 0xae1   :  { %v1686_v26 = vpop.f32.mrf.mxu1 }
 0xae3   :  { %v3152_v29 = vpop.f32.mrf.mxu1 }
 0xaea   :  { %v2448_v31 = vpop.f32.mrf.mxu0 }
 0xaeb   :  { %v2449_v60 = vadd.f32 %v2448_v31, %v2024_v57 }
 0xaec   :  { %v2450_v32 = vpop.f32.mrf.mxu0 }
 0xaed   :  { %v3381_v33 = vpop.eup %3380  ;;  %v2451_v63 = vadd.f32 %v2450_v32, %v2028_v58 }
 0xaee   :  { %1930 = vrot.lane.b32.xlu0 %v3381_v33, %s3412_s0  ;;  %v2452_v34 = vpop.f32.mrf.mxu0 }
 0xaf0   :  { %v2453_v35 = vpop.f32.mrf.mxu0 }
 0xb60   :  { %v1931_v39 = vpop.permute.xlu0 %1930 }
 0xb61   :  { %v2017_v40 = vpack.c.bf16 %v1931_v39, %v1931_v39  ;;  %v1936_v41 = vsel %vm395_vm6, %v1910_v24, %v1931_v39 }
 0xb62   :  { %v2016_v42 = vpack.c.bf16 %v1936_v41, %v1936_v41 }
 0xb63   :  { %2849 = vmatmul.mubr.msk.bf16.vlgmr.msra.gmra.mxu0 %vm395_vm6, %v2017_v40 }
 0xb64   :  { %2487 = vmatprep.mubr.bf16.mxu1 %v2016_v42 }
 0xb65   :  { %2488 = vmatmul.mubr.bf16.vlgmr.msra.gmra.mxu1 %v2015_v44 }
 0xb66   :  { %2642 = vmatpush1.bf16.msra.mxu1 %v3354_v43 }
 0xb67   :  { %2643 = vmatprep.subr.bf16.mxu1 %v3413_v30 }
 0xb6a   :  { %2644 = vmatpush1.bf16.msra.mxu1 %v3355_v45 }
 0xb6b   :  { %2645 = vmatprep.subr.bf16.mxu1 %v3413_v30 }
 0xb6e   :  { %2646 = vmatpush1.bf16.msra.mxu1 %v3356_v38 }
 0xb6f   :  { %2647 = vmatprep.subr.bf16.mxu1 %v3413_v30 }
 0xb72   :  { %2648 = vmatpush1.bf16.msra.mxu1 %v3357_v46 }
 0xb73   :  { %2649 = vmatprep.subr.bf16.mxu1 %v3413_v30 }
 0xb76   :  { %2650 = vmatpush1.bf16.msra.mxu1 %v3358_v9 }
 0xb77   :  { %2651 = vmatprep.subr.bf16.mxu1 %v3413_v30 }
 0xb7a   :  { %2652 = vmatpush1.bf16.msra.mxu1 %v3359_v47 }
 0xb7b   :  { %2653 = vmatprep.subr.bf16.mxu1 %v3413_v30 }
 0xb7e   :  { %2654 = vmatpush1.bf16.msra.mxu1 %v3360_v10 }
 0xb7f   :  { %2655 = vmatprep.subr.bf16.mxu1 %v3413_v30 }
 0xb82   :  { %2656 = vmatpush1.bf16.msra.mxu1 %v3361_v16 }
 0xb83   :  { %2665 = vmatprep.subr.bf16.mxu1 %v3413_v30 }
 0xb86   :  { %2666 = vmatpush2.bf16.msra.mxu1 %v3362_v48 }
 0xb87   :  { %2667 = vmatprep.subr.bf16.mxu1 %v3413_v30 }
 0xb8a   :  { %2668 = vmatpush2.bf16.msra.mxu1 %v3363_v49 }
 0xb8b   :  { %2669 = vmatprep.subr.bf16.mxu1 %v3413_v30 }
 0xb8e   :  { %2670 = vmatpush2.bf16.msra.mxu1 %v3364_v50 }
 0xb8f   :  { %2671 = vmatprep.subr.bf16.mxu1 %v3413_v30 }
 0xb92   :  { %2672 = vmatpush2.bf16.msra.mxu1 %v3365_v51 }
 0xc23   :  { %v2530_v59 = vpop.f32.mrf.mxu0 }
 0xc25   :  { %v2489_v61 = vpop.f32.mrf.mxu1  ;;  %v2532_v62 = vpop.f32.mrf.mxu0 }
 0xc26   :  { %v2490_v0 = vadd.f32 %v2489_v61, %v2449_v60 }
 0xc27   :  { %v2491_v1 = vpop.f32.mrf.mxu1  ;;  %v2534_v2 = vpop.f32.mrf.mxu0 }
 0xc28   :  { %v2531_v3 = vadd.f32 %v2530_v59, %v2490_v0  ;;  %v2492_v4 = vadd.f32 %v2491_v1, %v2451_v63 }
 0xc29   :  { %v2493_v5 = vpop.f32.mrf.mxu1  ;;  %v2535_v6 = vpop.f32.mrf.mxu0 }
 0xc2a   :  { %v2533_v7 = vadd.f32 %v2532_v62, %v2492_v4  ;;  %3382 = vtanh.f32 %v2531_v3 }
 0xc2b   :  { %v2494_v8 = vpop.f32.mrf.mxu1 }
 0xc2c   :  { %3384 = vtanh.f32 %v2533_v7 }
 0xc37   :  { %v3383_v11 = vpop.eup %3382 }
 0xc38   :  { %v2563_v14 = vpack.c.bf16 %v3383_v11, %v3383_v11 }
 0xc39   :  { %v3385_v12 = vpop.eup %3384 }
 0xc3a   :  { %v2564_v13 = vpack.c.bf16 %v3385_v12, %v3385_v12 }
 0xc3c   :  { %2862 = vmatprep.mubr.msk.bf16.mxu1 %vm392_vm5, %v2564_v13 }
 0xc3d   :  { %2674 = vmatmul.mubr.bf16.vlgmr.msra.gmra.mxu1 %v2563_v14 }
 0xcfd   :  { %v2675_v17 = vpop.f32.mrf.mxu1 }
 0xcfe   :  { %v2676_v18 = vadd.f32 %v2675_v17, %v2565_v15 }
 0xcff   :  { %v2677_v19 = vpop.f32.mrf.mxu1 }
 0xd00   :  { %2682 = vst.msk [vmem:[#allocation2] sm:$0xff] %vm2681_vm10, %v2676_v18 }
 0xd01   :  { %v2678_v20 = vpop.f32.mrf.mxu1 }
 0xd02   :  { %3397 = shalt.err (!%p3394_p4)
}
 0xd03   :  { %2692 = dma.vmem_to_hbm [thread:$0]  %s2690_s26, 128, %s4159_s4, [#allocation3]   ;;  %v2679_v21 = vpop.f32.mrf.mxu1 }
 0xd04   :  { %3406 = dma.done.wait [#allocation3], 128  }
 0xd05   :  { %3407 = vsyncadd [#allocation3], 4294967168 }
 0xd06   :  { %2696 = vsyncpa [#allocation3], 1 }

</bundles_post_ra>
